<compile_context>
chip_gen: v5e
topology: v5e:2x2
jax: 0.10.0
libtpu: 0.0.40
codegen_flags: <defaults>
</compile_context>

<pallas_src>
import jax
import jax.numpy as jnp
from jax.experimental import pallas as pl
from jax.experimental.pallas import tpu as pltpu


def _lsa_kernel(enc_ref, dec_ref, taps_ref, mask_ref,
                w_kh_ref, w_enc_ref, b_enc_ref, w_dec_ref, w_wt_ref, w_b_ref,
                ctx_ref, attw_ref):
    Bb, T, E = enc_ref.shape
    K = taps_ref.shape[2]
    H = w_enc_ref.shape[1]

    enc3 = enc_ref[...]                              # (Bb, T, E)
    enc2 = enc3.reshape(Bb * T, E)                   # cheap: T multiple of 8
    taps2 = taps_ref[...].reshape(Bb * T, K)         # (Bb*T, K)
    dec = dec_ref[...][:, 0, :]                      # (Bb, D)
    mask = mask_ref[...][:, 0, :]                    # (Bb, T), 1.0 = padded

    # Projections on the MXU with M = Bb*T.
    # Location conv + mlp_att are pre-folded into w_kh (K, H) in the wrapper,
    # so the whole location branch is one matmul.  The enc projection is kept
    # as a separate matmul (for realistic E=512 both already need their own
    # MXU passes, and this avoids an unaligned lane concat).
    att_h = jnp.dot(taps2, w_kh_ref[...],
                    preferred_element_type=jnp.float32)              # (Bb*T, H)
    proc = jnp.dot(enc2, w_enc_ref[...],
                   preferred_element_type=jnp.float32)               # (Bb*T, H)
    dec_h = jnp.dot(dec, w_dec_ref[...],
                    preferred_element_type=jnp.float32)              # (Bb, H)

    pre = (att_h + proc + b_enc_ref[...]).reshape(Bb, T, H) + dec_h[:, None, :]
    pre = jnp.tanh(pre)                                              # (Bb, T, H)

    # erg[b, t] = sum_h pre[b, t, h] * w[h] + b  -> lane-dense (Bb, T)
    erg = jnp.sum(pre * w_wt_ref[...][None, :, :], axis=-1) + w_b_ref[...]
    # masked_fill_(mask, -inf).  NOTE: like the PyTorch module, a fully
    # masked row would produce NaNs in the softmax.
    erg = jnp.where(mask > 0.0, -jnp.inf, erg)

    # softmax over time (lane axis)
    m = jnp.max(erg, axis=-1, keepdims=True)                         # (Bb, 1)
    e = jnp.exp(erg - m)
    s = jnp.sum(e, axis=-1, keepdims=True)
    w = e * pl.reciprocal(s, approx=True)                            # (Bb, T)

    w3 = w[:, None, :]                                               # (Bb, 1, T)
    attw_ref[...] = w3
    # attention context on the MXU: (Bb,1,T) x (Bb,T,E) -> (Bb,1,E)
    ctx_ref[...] = jnp.einsum('bqt,bte->bqe', w3, enc3,
                              preferred_element_type=jnp.float32)


def location_sensitive_attention(enc, dec_state, att_prev, mask, params,
                                 *, block_b=None):
    """Pallas wrapper.

    enc: (B, T, E), dec_state: (B, D), att_prev: (B, T), mask: (B, T) bool
    (True on padding).  Returns (context (B, E), attention_weights (B, T)).
    """
    B, T, E = enc.shape
    D = dec_state.shape[-1]
    K, C = params["conv_w"].shape
    H = params["w_enc"].shape[1]
    assert K % 2 == 1, "conv kernel size must be odd ('same' padding)"
    pad = (K - 1) // 2

    if block_b is None:
        block_b = B
    assert B % block_b == 0, "batch must be divisible by block_b"
    n_blocks = B // block_b

    # Fold Conv1d(1 -> C, K, no bias) followed by mlp_att (C -> H, no bias)
    # into a single (K, H) weight, and build the conv taps so the whole
    # location branch is one MXU matmul inside the kernel.
    w_kh = params["conv_w"] @ params["w_att"]                        # (K, H)
    attp = jnp.pad(att_prev, ((0, 0), (pad, pad)))                   # (B, T+K-1)
    taps = jnp.stack([attp[:, k:k + T] for k in range(K)], axis=-1)  # (B, T, K)

    dec3 = dec_state[:, None, :]                                     # (B, 1, D)
    mask3 = mask.astype(jnp.float32)[:, None, :]                     # (B, 1, T)
    w_wt = params["w_w"].T                                           # (1, H)

    out_shapes = (
        jax.ShapeDtypeStruct((B, 1, E), jnp.float32),   # context
        jax.ShapeDtypeStruct((B, 1, T), jnp.float32),   # attention weights
    )

    grid_spec = pltpu.PrefetchScalarGridSpec(
        num_scalar_prefetch=0,
        grid=(n_blocks,),
        in_specs=[
            pl.BlockSpec((block_b, T, E), lambda i: (i, 0, 0)),   # enc
            pl.BlockSpec((block_b, 1, D), lambda i: (i, 0, 0)),   # decoder state
            pl.BlockSpec((block_b, T, K), lambda i: (i, 0, 0)),   # conv taps
            pl.BlockSpec((block_b, 1, T), lambda i: (i, 0, 0)),   # padding mask
            pl.BlockSpec((K, H), lambda i: (0, 0)),               # conv_w @ w_att
            pl.BlockSpec((E, H), lambda i: (0, 0)),               # mlp_enc.weight^T
            pl.BlockSpec((1, H), lambda i: (0, 0)),               # mlp_enc.bias
            pl.BlockSpec((D, H), lambda i: (0, 0)),               # mlp_dec.weight^T
            pl.BlockSpec((1, H), lambda i: (0, 0)),               # w.weight (row)
            pl.BlockSpec((1, 1), lambda i: (0, 0)),               # w.bias
        ],
        out_specs=[
            pl.BlockSpec((block_b, 1, E), lambda i: (i, 0, 0)),
            pl.BlockSpec((block_b, 1, T), lambda i: (i, 0, 0)),
        ],
    )

    ctx, attw = pl.pallas_call(
        _lsa_kernel,
        out_shape=out_shapes,
        grid_spec=grid_spec,
        compiler_params=pltpu.CompilerParams(
            dimension_semantics=("parallel",)),
    )(enc, dec3, taps, mask3,
      w_kh, params["w_enc"], params["b_enc"], params["w_dec"], w_wt,
      params["w_b"])

    return ctx[:, 0, :], attw[:, 0, :]


def reference_forward(enc, dec_state, att_prev, mask, params):
    """Pure-JAX reference matching the PyTorch module semantics."""
    K, _ = params["conv_w"].shape
    pad = (K - 1) // 2
    T = att_prev.shape[1]
    proc = enc @ params["w_enc"] + params["b_enc"]                    # (B,T,H)
    attp = jnp.pad(att_prev, ((0, 0), (pad, pad)))
    taps = jnp.stack([attp[:, k:k + T] for k in range(K)], axis=-1)   # (B,T,K)
    conv = taps @ params["conv_w"]                                    # (B,T,C)
    att_h = conv @ params["w_att"]                                    # (B,T,H)
    dec_h = dec_state @ params["w_dec"]                               # (B,H)
    erg = (jnp.tanh(att_h + proc + dec_h[:, None, :]) @ params["w_w"]
           + params["w_b"])[..., 0]                                   # (B,T)
    erg = jnp.where(mask, -jnp.inf, erg)
    w = jax.nn.softmax(erg, axis=1)
    ctx = jnp.sum(enc * w[..., None], axis=1)
    return ctx, w


if __name__ == "__main__":
    # Small shapes consistent with the module (encoder_dim=E, decoder_dim=D,
    # hidden_dim=H, conv_channels=C, conv_kernel_size=K odd).  block_b=4 gives
    # Bb*T = 128 rows per MXU call and a 2-block parallel grid.
    B, T, E, D, H, C, K = 8, 32, 32, 64, 32, 8, 7
    Bb = 4

    key = jax.random.PRNGKey(0)
    ks = jax.random.split(key, 10)

    params = {
        "w_enc": 0.1 * jax.random.normal(ks[0], (E, H), jnp.float32),
        "b_enc": 0.1 * jax.random.normal(ks[1], (1, H), jnp.float32),
        "w_dec": 0.1 * jax.random.normal(ks[2], (D, H), jnp.float32),
        "w_att": 0.1 * jax.random.normal(ks[3], (C, H), jnp.float32),
        "conv_w": 0.1 * jax.random.normal(ks[4], (K, C), jnp.float32),
        "w_w": 0.1 * jax.random.normal(ks[5], (H, 1), jnp.float32),
        "w_b": 0.1 * jax.random.normal(ks[6], (1, 1), jnp.float32),
    }

    enc = jax.random.normal(ks[7], (B, T, E), jnp.float32)
    dec_state = jax.random.normal(ks[8], (B, D), jnp.float32)

    # src_lens / padding mask and the "previous attention" the module would
    # build when att_prev is None (uniform over the valid frames).
    src_lens = jnp.array([32, 27, 32, 20, 16, 32, 24, 9], jnp.int32)
    pos = jnp.arange(T)[None, :]
    mask = pos >= src_lens[:, None]                        # True on padding
    valid = (~mask).astype(jnp.float32)
    att_prev = valid / src_lens[:, None].astype(jnp.float32)

    ctx, attw = location_sensitive_attention(
        enc, dec_state, att_prev, mask, params, block_b=Bb)
    jax.block_until_ready((ctx, attw))

    ctx_ref, attw_ref = reference_forward(enc, dec_state, att_prev, mask, params)
    assert jnp.allclose(ctx, ctx_ref, rtol=1e-3, atol=1e-3)
    assert jnp.allclose(attw, attw_ref, rtol=1e-3, atol=1e-3)

    print("KERNEL_OK")
</pallas_src>

<mosaic_0001>
module attributes {stable_mosaic.version = 11 : i64} {
  func.func @_lsa_kernel(%arg0: i32, %arg1: memref<4x32x32xf32, #tpu.memory_space<vmem>>, %arg2: memref<4x1x64xf32, #tpu.memory_space<vmem>>, %arg3: memref<4x32x7xf32, #tpu.memory_space<vmem>>, %arg4: memref<4x1x32xf32, #tpu.memory_space<vmem>>, %arg5: memref<7x32xf32, #tpu.memory_space<vmem>>, %arg6: memref<32x32xf32, #tpu.memory_space<vmem>>, %arg7: memref<1x32xf32, #tpu.memory_space<vmem>>, %arg8: memref<64x32xf32, #tpu.memory_space<vmem>>, %arg9: memref<1x32xf32, #tpu.memory_space<vmem>>, %arg10: memref<1x1xf32, #tpu.memory_space<vmem>>, %arg11: memref<4x1x32xf32, #tpu.memory_space<vmem>>, %arg12: memref<4x1x32xf32, #tpu.memory_space<vmem>>) attributes {dimension_semantics = [#tpu.dimension_semantics<parallel>], iteration_bounds = array<i64: 2>, scalar_prefetch = 0 : i64, scratch_operands = 0 : i64, tpu.core_type = #tpu.core_type<tc>, window_params = [{transform_indices = @transform_0, window_bounds = array<i64: 4, 32, 32>}, {transform_indices = @transform_1, window_bounds = array<i64: 4, 1, 64>}, {transform_indices = @transform_2, window_bounds = array<i64: 4, 32, 7>}, {transform_indices = @transform_3, window_bounds = array<i64: 4, 1, 32>}, {pipeline_mode = #tpu.pipeline_mode<synchronous>, transform_indices = @transform_4, window_bounds = array<i64: 7, 32>}, {pipeline_mode = #tpu.pipeline_mode<synchronous>, transform_indices = @transform_5, window_bounds = array<i64: 32, 32>}, {pipeline_mode = #tpu.pipeline_mode<synchronous>, transform_indices = @transform_6, window_bounds = array<i64: 1, 32>}, {pipeline_mode = #tpu.pipeline_mode<synchronous>, transform_indices = @transform_7, window_bounds = array<i64: 64, 32>}, {pipeline_mode = #tpu.pipeline_mode<synchronous>, transform_indices = @transform_8, window_bounds = array<i64: 1, 32>}, {pipeline_mode = #tpu.pipeline_mode<synchronous>, transform_indices = @transform_9, window_bounds = array<i64: 1, 1>}, {transform_indices = @transform_10, window_bounds = array<i64: 4, 1, 32>}, {transform_indices = @transform_11, window_bounds = array<i64: 4, 1, 32>}]} {
    %c0 = arith.constant 0 : index
    %c0_0 = arith.constant 0 : index
    %c0_1 = arith.constant 0 : index
    %0 = vector.load %arg1[%c0, %c0_0, %c0_1] : memref<4x32x32xf32, #tpu.memory_space<vmem>>, vector<4x32x32xf32>
    %1 = vector.shape_cast %0 : vector<4x32x32xf32> to vector<128x32xf32>
    %c0_2 = arith.constant 0 : index
    %c0_3 = arith.constant 0 : index
    %c0_4 = arith.constant 0 : index
    %2 = vector.load %arg3[%c0_2, %c0_3, %c0_4] : memref<4x32x7xf32, #tpu.memory_space<vmem>>, vector<4x32x7xf32>
    %3 = vector.shape_cast %2 : vector<4x32x7xf32> to vector<128x7xf32>
    %c0_5 = arith.constant 0 : index
    %c0_6 = arith.constant 0 : index
    %c0_7 = arith.constant 0 : index
    %4 = vector.load %arg2[%c0_5, %c0_6, %c0_7] : memref<4x1x64xf32, #tpu.memory_space<vmem>>, vector<4x1x64xf32>
    %5 = vector.shape_cast %4 : vector<4x1x64xf32> to vector<4x64xf32>
    %c0_8 = arith.constant 0 : index
    %c0_9 = arith.constant 0 : index
    %c0_10 = arith.constant 0 : index
    %6 = vector.load %arg4[%c0_8, %c0_9, %c0_10] : memref<4x1x32xf32, #tpu.memory_space<vmem>>, vector<4x1x32xf32>
    %7 = vector.shape_cast %6 : vector<4x1x32xf32> to vector<4x32xf32>
    %c0_11 = arith.constant 0 : index
    %c0_12 = arith.constant 0 : index
    %8 = vector.load %arg5[%c0_11, %c0_12] : memref<7x32xf32, #tpu.memory_space<vmem>>, vector<7x32xf32>
    %cst = arith.constant dense<0.000000e+00> : vector<128x32xf32>
    %9 = tpu.matmul %3, %8, %cst {dimension_numbers = #tpu.dot_dimension_numbers<[1], [0], [0], [1], [0, 0, 1, 1], [], []>} : vector<128x7xf32>, vector<7x32xf32>, vector<128x32xf32> -> vector<128x32xf32>
    %c0_13 = arith.constant 0 : index
    %c0_14 = arith.constant 0 : index
    %10 = vector.load %arg6[%c0_13, %c0_14] : memref<32x32xf32, #tpu.memory_space<vmem>>, vector<32x32xf32>
    %cst_15 = arith.constant dense<0.000000e+00> : vector<128x32xf32>
    %11 = tpu.matmul %1, %10, %cst_15 {dimension_numbers = #tpu.dot_dimension_numbers<[1], [0], [0], [1], [0, 0, 1, 1], [], []>} : vector<128x32xf32>, vector<32x32xf32>, vector<128x32xf32> -> vector<128x32xf32>
    %c0_16 = arith.constant 0 : index
    %c0_17 = arith.constant 0 : index
    %12 = vector.load %arg8[%c0_16, %c0_17] : memref<64x32xf32, #tpu.memory_space<vmem>>, vector<64x32xf32>
    %cst_18 = arith.constant dense<0.000000e+00> : vector<4x32xf32>
    %13 = tpu.matmul %5, %12, %cst_18 {dimension_numbers = #tpu.dot_dimension_numbers<[1], [0], [0], [1], [0, 0, 1, 1], [], []>} : vector<4x64xf32>, vector<64x32xf32>, vector<4x32xf32> -> vector<4x32xf32>
    %14 = arith.addf %9, %11 : vector<128x32xf32>
    %c0_19 = arith.constant 0 : index
    %c0_20 = arith.constant 0 : index
    %15 = vector.load %arg7[%c0_19, %c0_20] : memref<1x32xf32, #tpu.memory_space<vmem>>, vector<1x32xf32>
    %16 = vector.broadcast %15 : vector<1x32xf32> to vector<128x32xf32>
    %17 = arith.addf %14, %16 : vector<128x32xf32>
    %18 = vector.shape_cast %17 : vector<128x32xf32> to vector<4x32x32xf32>
    %19 = vector.shape_cast %13 : vector<4x32xf32> to vector<4x1x32xf32>
    %20 = vector.broadcast %19 : vector<4x1x32xf32> to vector<4x32x32xf32>
    %21 = arith.addf %18, %20 : vector<4x32x32xf32>
    %22 = math.tanh %21 : vector<4x32x32xf32>
    %c0_21 = arith.constant 0 : index
    %c0_22 = arith.constant 0 : index
    %23 = vector.load %arg9[%c0_21, %c0_22] : memref<1x32xf32, #tpu.memory_space<vmem>>, vector<1x32xf32>
    %24 = vector.shape_cast %23 : vector<1x32xf32> to vector<1x1x32xf32>
    %25 = vector.broadcast %24 : vector<1x1x32xf32> to vector<4x32x32xf32>
    %26 = arith.mulf %22, %25 : vector<4x32x32xf32>
    %cst_23 = arith.constant dense<0.000000e+00> : vector<4x32xf32>
    %27 = vector.multi_reduction <add>, %26, %cst_23 [2] : vector<4x32x32xf32> to vector<4x32xf32>
    %c0_24 = arith.constant 0 : index
    %c0_25 = arith.constant 0 : index
    %28 = vector.load %arg10[%c0_24, %c0_25] : memref<1x1xf32, #tpu.memory_space<vmem>>, vector<1x1xf32>
    %29 = vector.broadcast %28 : vector<1x1xf32> to vector<4x32xf32>
    %30 = arith.addf %27, %29 : vector<4x32xf32>
    %cst_26 = arith.constant 0.000000e+00 : f32
    %31 = vector.broadcast %cst_26 : f32 to vector<4x32xf32>
    %32 = arith.cmpf ogt, %7, %31 : vector<4x32xf32>
    %cst_27 = arith.constant 0xFF800000 : f32
    %33 = vector.broadcast %cst_27 : f32 to vector<4x32xf32>
    %34 = arith.select %32, %33, %30 : vector<4x32xi1>, vector<4x32xf32>
    %cst_28 = arith.constant dense<0xFF800000> : vector<4xf32>
    %35 = vector.multi_reduction <maximumf>, %34, %cst_28 [1] : vector<4x32xf32> to vector<4xf32>
    %36 = vector.shape_cast %35 : vector<4xf32> to vector<4x1xf32>
    %37 = vector.broadcast %36 : vector<4x1xf32> to vector<4x32xf32>
    %38 = arith.subf %34, %37 : vector<4x32xf32>
    %39 = math.exp %38 : vector<4x32xf32>
    %cst_29 = arith.constant dense<0.000000e+00> : vector<4xf32>
    %40 = vector.multi_reduction <add>, %39, %cst_29 [1] : vector<4x32xf32> to vector<4xf32>
    %41 = vector.shape_cast %40 : vector<4xf32> to vector<4x1xf32>
    %42 = tpu.reciprocal %41 {approx = true} : vector<4x1xf32> -> vector<4x1xf32>
    %43 = vector.broadcast %42 : vector<4x1xf32> to vector<4x32xf32>
    %44 = arith.mulf %39, %43 : vector<4x32xf32>
    %45 = vector.shape_cast %44 : vector<4x32xf32> to vector<4x1x32xf32>
    %c0_30 = arith.constant 0 : index
    %c0_31 = arith.constant 0 : index
    %c0_32 = arith.constant 0 : index
    %46 = vector.load %arg12[%c0_30, %c0_31, %c0_32] : memref<4x1x32xf32, #tpu.memory_space<vmem>>, vector<4x1x32xf32>
    tpu.vector_store %arg12[%c0_30, %c0_31, %c0_32], %45 {strides = array<i32>} : memref<4x1x32xf32, #tpu.memory_space<vmem>>, vector<4x1x32xf32>,
    "tpu.trace_start"() <{level = 10 : i32, message = "bqt,bte->bqe"}> : () -> ()
    %cst_33 = arith.constant dense<0.000000e+00> : vector<4x1x32xf32>
    %47 = tpu.matmul %45, %0, %cst_33 {dimension_numbers = #tpu.dot_dimension_numbers<[2], [1], [1], [2], [0, 0, 0, 1, 1, 2], [0], [0]>} : vector<4x1x32xf32>, vector<4x32x32xf32>, vector<4x1x32xf32> -> vector<4x1x32xf32>
    "tpu.trace_stop"() : () -> ()
    %c0_34 = arith.constant 0 : index
    %c0_35 = arith.constant 0 : index
    %c0_36 = arith.constant 0 : index
    %48 = vector.load %arg11[%c0_34, %c0_35, %c0_36] : memref<4x1x32xf32, #tpu.memory_space<vmem>>, vector<4x1x32xf32>
    tpu.vector_store %arg11[%c0_34, %c0_35, %c0_36], %47 {strides = array<i32>} : memref<4x1x32xf32, #tpu.memory_space<vmem>>, vector<4x1x32xf32>,
    return
  }
  func.func @transform_0(%arg0: i32) -> (i32, i32, i32) {
    %c0_i32 = arith.constant 0 : i32
    %c0_i32_0 = arith.constant 0 : i32
    %c0_i32_1 = arith.constant 0 : i32
    return %arg0, %c0_i32, %c0_i32_0 : i32, i32, i32
  }
  func.func @transform_1(%arg0: i32) -> (i32, i32, i32) {
    %c0_i32 = arith.constant 0 : i32
    %c0_i32_0 = arith.constant 0 : i32
    %c0_i32_1 = arith.constant 0 : i32
    return %arg0, %c0_i32, %c0_i32_0 : i32, i32, i32
  }
  func.func @transform_2(%arg0: i32) -> (i32, i32, i32) {
    %c0_i32 = arith.constant 0 : i32
    %c0_i32_0 = arith.constant 0 : i32
    %c0_i32_1 = arith.constant 0 : i32
    return %arg0, %c0_i32, %c0_i32_0 : i32, i32, i32
  }
  func.func @transform_3(%arg0: i32) -> (i32, i32, i32) {
    %c0_i32 = arith.constant 0 : i32
    %c0_i32_0 = arith.constant 0 : i32
    %c0_i32_1 = arith.constant 0 : i32
    return %arg0, %c0_i32, %c0_i32_0 : i32, i32, i32
  }
  func.func @transform_4(%arg0: i32) -> (i32, i32) {
    %c0_i32 = arith.constant 0 : i32
    %c0_i32_0 = arith.constant 0 : i32
    %c0_i32_1 = arith.constant 0 : i32
    return %c0_i32, %c0_i32_0 : i32, i32
  }
  func.func @transform_5(%arg0: i32) -> (i32, i32) {
    %c0_i32 = arith.constant 0 : i32
    %c0_i32_0 = arith.constant 0 : i32
    %c0_i32_1 = arith.constant 0 : i32
    return %c0_i32, %c0_i32_0 : i32, i32
  }
  func.func @transform_6(%arg0: i32) -> (i32, i32) {
    %c0_i32 = arith.constant 0 : i32
    %c0_i32_0 = arith.constant 0 : i32
    %c0_i32_1 = arith.constant 0 : i32
    return %c0_i32, %c0_i32_0 : i32, i32
  }
  func.func @transform_7(%arg0: i32) -> (i32, i32) {
    %c0_i32 = arith.constant 0 : i32
    %c0_i32_0 = arith.constant 0 : i32
    %c0_i32_1 = arith.constant 0 : i32
    return %c0_i32, %c0_i32_0 : i32, i32
  }
  func.func @transform_8(%arg0: i32) -> (i32, i32) {
    %c0_i32 = arith.constant 0 : i32
    %c0_i32_0 = arith.constant 0 : i32
    %c0_i32_1 = arith.constant 0 : i32
    return %c0_i32, %c0_i32_0 : i32, i32
  }
  func.func @transform_9(%arg0: i32) -> (i32, i32) {
    %c0_i32 = arith.constant 0 : i32
    %c0_i32_0 = arith.constant 0 : i32
    %c0_i32_1 = arith.constant 0 : i32
    return %c0_i32, %c0_i32_0 : i32, i32
  }
  func.func @transform_10(%arg0: i32) -> (i32, i32, i32) {
    %c0_i32 = arith.constant 0 : i32
    %c0_i32_0 = arith.constant 0 : i32
    %c0_i32_1 = arith.constant 0 : i32
    return %arg0, %c0_i32, %c0_i32_0 : i32, i32, i32
  }
  func.func @transform_11(%arg0: i32) -> (i32, i32, i32) {
    %c0_i32 = arith.constant 0 : i32
    %c0_i32_0 = arith.constant 0 : i32
    %c0_i32_1 = arith.constant 0 : i32
    return %arg0, %c0_i32, %c0_i32_0 : i32, i32, i32
  }
}

</mosaic_0001>

<bundles_post_ra>
// kernel: tpu_custom_call.1
= control target key start
LH: loop header
LB: loop body
LE: loop exit
PB: predicated region body
PF: predicated region fallthrough
CT: control target
= control target key end

     0   :  { %s2408_s0 = inlined_call_operand.vmem [shape: f32[8,32,32], index: 0, kind: input, shape index: {}]   ;;  %s2409_s1 = inlined_call_operand.vmem [shape: f32[8,1,64], index: 1, kind: input, shape index: {}]   ;;  %s2410_s2 = inlined_call_operand.vmem [shape: f32[8,32,7], index: 2, kind: input, shape index: {}]   ;;  %s2411_s3 = inlined_call_operand.vmem [shape: f32[8,1,32], index: 3, kind: input, shape index: {}]   ;;  %s2412_s4 = inlined_call_operand.vmem [shape: f32[7,32], index: 4, kind: input, shape index: {}]   ;;  %s2413_s5 = inlined_call_operand.vmem [shape: f32[32,32], index: 5, kind: input, shape index: {}]   ;;  %s2414_s6 = inlined_call_operand.vmem [shape: f32[1,32], index: 6, kind: input, shape index: {}]   ;;  %s2415_s7 = inlined_call_operand.vmem [shape: f32[64,32], index: 7, kind: input, shape index: {}]   ;;  %s2416_s8 = inlined_call_operand.vmem [shape: f32[1,32], index: 8, kind: input, shape index: {}]   ;;  %s2417_s9 = inlined_call_operand.<no memory space> [shape: f32[1,1], index: 9, kind: input, shape index: {}]   ;;  %s2418_s10 = inlined_call_operand.hbm [shape: f32[8,1,32], index: 10, kind: output, shape index: {0}]   ;;  %s2419_s11 = inlined_call_operand.hbm [shape: f32[8,1,32], index: 11, kind: output, shape index: {1}]  }
   0x1   :  { %2421 = sst [smem:[#allocation9_spill]] %s2408_s0  ;;  %v17_v0 = vstv %s2417_s9 }
   0x2   :  { %2422 = sst [smem:[#allocation10_spill]] %s2409_s1  ;;  %18 = vst [vmem:[#allocation2] sm:$0x1] %v17_v0 }
   0x3   :  { %2423 = sst [smem:[#allocation11_spill]] %s2412_s4 }
   0x4   :  { %19 = vsyncpa [#allocation4], 0 }
   0x5   :  { %21 = vsyncpa [#allocation4 + $0x1], 0 }
   0x6   :  { %22 = vsyncpa [#allocation6], 0 }
   0x7   :  { %24 = vsyncpa [#allocation6 + $0x1], 0  ;;  %s1990_s19 = smov 0   ;;  %s1992_s20 = smov 0  }
   0x8   :  { %s1994_s21 = smov 0   ;;  %s1996_s22 = smov 0  }
   0x9 LB: > { %s1663_s9 = sadd.s32 4294967295, %s1922_s22   ;;  %s1664_s23 = sadd.s32 4294967294, %s1922_s22   ;;  %s1922_s22 = sphi %s1996_s22, %s2433_s22   ;;  %s1918_s21 = sphi %s1994_s21, %s2432_s21   ;;  %s1914_s20 = sphi %s1992_s20, %s2431_s20   ;;  %s1910_s19 = sphi %s1990_s19, %s2430_s19  }
   0xa   : > { %s2013_s24 = sadd.s32 1, %s1922_s22   ;;  %s267_s25 = sadd.s32 1, %s1918_s21 }
   0xb   : > { %s264_s26 = ssub.s32 %s1922_s22, %s2013_s24  ;;  %p277_p0 = scmp.ne.s32.totalorder %s1918_s21, %s1914_s20 }
   0xc   : > { %p265_p1 = scmp.eq.s32.totalorder %s264_s26, 0  ;;  %p278_p2 = scmp.eq.s32.totalorder %s1663_s9, 1 }
   0xd   : > { %p283_p3 = scmp.ne.s32.totalorder %s1914_s20, %s1910_s19  ;;  %p284_p4 = scmp.eq.s32.totalorder %s1664_s23, 1 }
   0xe   : > { %s2023_s27 = scalar_select %p265_p1, %s1918_s21, %s267_s25  }
   0xf   : > { %p2025_p5 = por %p278_p2, %p277_p0  ;;  %p2029_p6 = por %p284_p4, %p283_p3 }
  0x10   : > { %p1667_p7 = scmp.ge.s32.totalorder %s1922_s22, 1  ;;  %p382_p8 = scmp.lt.s32.totalorder %s1922_s22, 3 }
  0x12   : > { %p383_p9 = pnand %p1667_p7, %p382_p8 }
  0x13   : > { %s2041_s15 = sshll.u32 (!%p383_p9), %s1663_s9, 2  ;;  %s2426_s4 = sld [smem:[#allocation11_spill]] (!%p383_p9) }
  0x14   : > { %386 = sbr.rel (%p383_p9) target bundleno = 1148 (0x47c), region = 60  ;;  %p443_p10 = scmp.lt.s32.totalorder (!%p383_p9), %s2041_s15, 7 }
  0x15   : > { %s2427_s1 = sld [smem:[#allocation10_spill]] (!%p383_p9)  ;;  %s1535_s23 = scalar_lea.hbm (!%p383_p9), %s2419_s11, %s2041_s15 }
  0x16   : > { %s2428_s0 = sld [smem:[#allocation9_spill]] (!%p383_p9)  ;;  %s1538_s9 = sshll.u32 (!%p383_p9), %s1535_s23, 4  ;;  %s1539_s9 = int_to_ptr.hbm [resolvable:$true] %s1538_s9 }
  0x19   : > { %v512_v1 = vld [vmem:[%s2413_s5 + $0x18] sm:$0xff]  ;;  %v511_v2 = vld [vmem:[%s2413_s5 + $0x10] sm:$0xff]  ;;  %vm719_vm0 = vcmask 1046528   ;;  %v508_v3 = vld [vmem:[%s2426_s4] sm:$0x7f]  ;;  %s2051_s25 = scalar_select %p443_p10, %s2041_s15, 7 }
  0x1a   : > { %1724 = vmatpush.msra.mxu1 %v512_v1  ;;  %574 = vmatpush.msra.mxu0 %v512_v1  ;;  %v510_v4 = vld [vmem:[%s2413_s5 + $0x8] sm:$0xff]  ;;  %v509_v5 = vld [vmem:[%s2413_s5] sm:$0xff]  ;;  %vm513_vm1 = vcmask 261120   ;;  %v634_v6 = vld [vmem:[%s2415_s7 + $0x38] sm:$0xff]  ;;  %vm670_vm2 = vcmask 56320   ;;  %vm647_vm3 = vcmask 523264  }
  0x1b   : > { %1695 = vmatpush.msk.msra.mxu2 %vm719_vm0, %v508_v3  ;;  %1728 = vmatpush.msk.msra.mxu3 %vm719_vm0, %v508_v3  ;;  %s1722_s30 = sshll.u32 %s2051_s25, 5  ;;  %s452_s14 = scalar_lea.vmem %s2427_s1, %s2051_s25  ;;  %v633_v15 = vld [vmem:[%s2415_s7 + $0x30] sm:$0xff]  ;;  %v632_v16 = vld [vmem:[%s2415_s7 + $0x28] sm:$0xff]  ;;  %v631_v17 = vld [vmem:[%s2415_s7 + $0x20] sm:$0xff]  ;;  %vm1295_vm4 = vcmask 130112   ;;  %vm1299_vm5 = vcmask 195712  }
  0x1c   : > { %1725 = vmatpush.msra.mxu1 %v511_v2  ;;  %575 = vmatpush.msra.mxu0 %v511_v2  ;;  %s2067_s4 = scalar_lea.vmem %s2428_s0, %s1722_s30  ;;  %v500_v7 = vld [vmem:[%s452_s14] sm:$0x1]  ;;  %v501_v8 = vld [vmem:[%s452_s14 + $0x1] sm:$0x1]  ;;  %v502_v9 = vld [vmem:[%s452_s14 + $0x2] sm:$0x1]  ;;  %s2072_s12 = scalar_lea.vmem %s2410_s2, %s1722_s30 }
  0x1d   : > { %v477_v10 = vld [vmem:[%s2067_s4 + $0x48] sm:$0xff]  ;;  %v503_v11 = vld [vmem:[%s452_s14 + $0x3] sm:$0x1]  ;;  %639 = vst [vmem:[#allocation1] ss:$9 sm:$0xff] %v500_v7  ;;  %v494_v13 = vld [vmem:[%s2072_s12 + $0x50] sm:$0xff]  ;;  %s2297_s13 = scalar_lea.vmem %s2411_s3, %s2051_s25 }
  0x1e   : > { %1726 = vmatpush.msra.mxu1 %v510_v4  ;;  %576 = vmatpush.msra.mxu0 %v510_v4  ;;  %v484_v12 = vld [vmem:[%s2072_s12] sm:$0xff]  ;;  %641 = vst [vmem:[#allocation1 + $0x1] ss:$9 sm:$0xff] %v501_v8  ;;  %v471_v18 = vld [vmem:[%s2067_s4 + $0x18] sm:$0xff]  ;;  %v478_v19 = vld [vmem:[%s2067_s4 + $0x50] sm:$0xff]  ;;  %vm1303_vm6 = vcmask 261312  }
  0x1f   : > { %1696 = vmatmul.msk.f32.vlgmr.msra.gmra.mxu2 %vm670_vm2, %v484_v12  ;;  %v468_v14 = vld [vmem:[%s2067_s4] sm:$0xff]  ;;  %643 = vst [vmem:[#allocation1 + $0x2] ss:$9 sm:$0xff] %v502_v9  ;;  %1706 = vmatmul.msk.f32.vlgmr.msra.gmra.mxu3 %vm670_vm2, %v494_v13  ;;  %v485_v20 = vld [vmem:[%s2072_s12 + $0x8] sm:$0xff]  ;;  %v495_v21 = vld [vmem:[%s2072_s12 + $0x58] sm:$0xff]  ;;  %vm1347_vm11 = vcmask 257024  }
  0x20   : > { %1727 = vmatpush.msra.mxu1 %v509_v5  ;;  %577 = vmatpush.msra.mxu0 %v509_v5  ;;  %645 = vst [vmem:[#allocation1 + $0x3] ss:$9 sm:$0xff] %v503_v11  ;;  %v470_v22 = vld [vmem:[%s2067_s4 + $0x10] sm:$0xff]  ;;  %v630_v23 = vld [vmem:[%s2415_s7 + $0x18] sm:$0xff]  ;;  %v469_v24 = vld [vmem:[%s2067_s4 + $0x8] sm:$0xff]  ;;  %s2332_s25 = sand.u32 1, %s1914_s20  }
  0x21   : > { %1687 = vmatmul.msk.f32.vlgmr.msra.gmra.mxu1 %vm513_vm1, %v477_v10  ;;  %1678 = vmatmul.msk.f32.vlgmr.msra.gmra.mxu0 %vm513_vm1, %v468_v14  ;;  %v629_v25 = vld [vmem:[%s2415_s7 + $0x10] sm:$0xff]  ;;  %v628_v26 = vld [vmem:[%s2415_s7 + $0x8] sm:$0xff]  ;;  %v479_v27 = vld [vmem:[%s2067_s4 + $0x58] sm:$0xff]  ;;  %s2420_s14 = sshll.u32 %s2332_s25, 2  ;;  %vm1402_vm12 = vcmask 253952   ;;  %s1509_s26 = scalar_lea.sflag [#allocation6], %s2332_s25 }
  0x22   : > { %658 = vmatpush.msrb.mxu1 %v634_v6  ;;  %1422 = vmatpush.msrb.mxu3 %v471_v18  ;;  %v486_v28 = vld [vmem:[%s2072_s12 + $0x10] sm:$0xff]  ;;  %v496_v29 = vld [vmem:[%s2072_s12 + $0x60] sm:$0xff]  ;;  %v487_v32 = vld [vmem:[%s2072_s12 + $0x18] sm:$0xff]  ;;  %s441_s16 = scalar_lea.vmem [#allocation5], %s2420_s14  ;;  %s1842_s30 = sshra.s32 %s1539_s9, 4  ;;  %s1843_s30 = int_to_ptr.hbm [resolvable:$true] %s1842_s30 }
  0x23   : > { %v627_v30 = vld [vmem:[%s2415_s7] sm:$0xff]  ;;  %v497_v33 = vld [vmem:[%s2072_s12 + $0x68] sm:$0xff]  ;;  %v475_v34 = vld [vmem:[%s2067_s4 + $0x38] sm:$0xff]  ;;  %s1536_s17 = sshll.u32 %s441_s16, 4  ;;  %s1848_s0 = scalar_lea.hbm %s2419_s11, 8  ;;  %s1537_s17 = int_to_ptr.vmem [resolvable:$true] %s1536_s17 }
  0x24   : > { %659 = vmatpush.msrb.mxu1 %v633_v15  ;;  %1423 = vmatpush.msrb.mxu3 %v470_v22  ;;  %v480_v31 = vld [vmem:[%s2067_s4 + $0x60] sm:$0xff]  ;;  %v474_v35 = vld [vmem:[%s2067_s4 + $0x30] sm:$0xff]  ;;  %v481_v36 = vld [vmem:[%s2067_s4 + $0x68] sm:$0xff]  ;;  %p1849_p0 = scmp.lt.s32.totalorder %s1843_s30, %s2419_s11 }
  0x25   : > { %v488_v37 = vld [vmem:[%s2072_s12 + $0x20] sm:$0xff]  ;;  %v473_v38 = vld [vmem:[%s2067_s4 + $0x28] sm:$0xff]  ;;  %v498_v39 = vld [vmem:[%s2072_s12 + $0x70] sm:$0xff] }
  0x26   : > { %660 = vmatpush.msrb.mxu1 %v632_v16  ;;  %1424 = vmatpush.msrb.mxu3 %v469_v24  ;;  %v472_v40 = vld [vmem:[%s2067_s4 + $0x20] sm:$0xff]  ;;  %v482_v42 = vld [vmem:[%s2067_s4 + $0x70] sm:$0xff]  ;;  %v489_v43 = vld [vmem:[%s2072_s12 + $0x28] sm:$0xff] }
  0x27   : > { %1697 = vmatmul.msk.f32.gmra.mxu2 %vm670_vm2, %v485_v20  ;;  %1707 = vmatmul.msk.f32.gmra.mxu3 %vm670_vm2, %v495_v21  ;;  %v476_v41 = vld [vmem:[%s2067_s4 + $0x40] sm:$0xff]  ;;  %v499_v44 = vld [vmem:[%s2072_s12 + $0x78] sm:$0xff]  ;;  %v490_v46 = vld [vmem:[%s2072_s12 + $0x30] sm:$0xff] }
  0x28   : > { %661 = vmatpush.msrb.mxu1 %v631_v17  ;;  %1425 = vmatpush.msrb.mxu3 %v468_v14  ;;  %v483_v45 = vld [vmem:[%s2067_s4 + $0x78] sm:$0xff]  ;;  %v646_v47 = vld [vmem:[#allocation1] sm:$0xff]  ;;  %v493_v50 = vld [vmem:[%s2072_s12 + $0x48] sm:$0xff] }
  0x29   : > { %1688 = vmatmul.msk.f32.gmra.mxu1 %vm513_vm1, %v478_v19  ;;  %1679 = vmatmul.msk.f32.gmra.mxu0 %vm513_vm1, %v469_v24  ;;  %v491_v48 = vld [vmem:[%s2072_s12 + $0x38] sm:$0xff]  ;;  %v492_v49 = vld [vmem:[%s2072_s12 + $0x40] sm:$0xff] }
  0x2a   : > { %662 = vmatpush.msrb.mxu1 %v630_v23  ;;  %1445 = vmatpush.msra.mxu3 %v475_v34  ;;  %v2178_v11 = vld [vmem:[%s2414_s6] ss:$0 sm:$0xff] }
  0x2c   : > { %663 = vmatpush.msrb.mxu1 %v629_v25  ;;  %1446 = vmatpush.msra.mxu3 %v474_v35  ;;  %v1924_v25 = vmov 0  }
  0x2d   : > { %1776 = vset.pattern.permute.xlu0 %v1924_v25  ;;  %1777 = vset.pattern.permute.xlu1 %v1924_v25 }
  0x2e   : > { %664 = vmatpush.msrb.mxu1 %v628_v26  ;;  %1447 = vmatpush.msra.mxu3 %v473_v38 }
  0x2f   : > { %1698 = vmatmul.msk.f32.gmra.mxu2 %vm670_vm2, %v486_v28  ;;  %1708 = vmatmul.msk.f32.gmra.mxu3 %vm670_vm2, %v496_v29 }
  0x30   : > { %665 = vmatpush.msrb.mxu1 %v627_v30  ;;  %1448 = vmatpush.msra.mxu3 %v472_v40 }
  0x31   : > { %1689 = vmatmul.msk.f32.gmra.mxu1 %vm513_vm1, %v479_v27  ;;  %1680 = vmatmul.msk.f32.gmra.mxu0 %vm513_vm1, %v470_v22 }
  0x32   : > { %1468 = vmatpush.msra.mxu1 %v479_v27  ;;  %1778 = vset.pattern.permute.xlu2 %v1924_v25 }
  0x34   : > { %1469 = vmatpush.msra.mxu1 %v478_v19 }
  0x36   : > { %1470 = vmatpush.msra.mxu1 %v477_v10 }
  0x37   : > { %1699 = vmatmul.msk.f32.gmra.mxu2 %vm670_vm2, %v487_v32  ;;  %1709 = vmatmul.msk.f32.gmra.mxu3 %vm670_vm2, %v497_v33 }
  0x38   : > { %1471 = vmatpush.msra.mxu1 %v476_v41 }
  0x39   : > { %1690 = vmatmul.msk.f32.gmra.mxu1 %vm513_vm1, %v480_v31  ;;  %1681 = vmatmul.msk.f32.gmra.mxu0 %vm513_vm1, %v471_v18 }
  0x3f   : > { %1700 = vmatmul.msk.f32.gmra.mxu2 %vm670_vm2, %v488_v37  ;;  %1710 = vmatmul.msk.f32.gmra.mxu3 %vm670_vm2, %v498_v39 }
  0x41   : > { %1691 = vmatmul.msk.f32.gmra.mxu1 %vm513_vm1, %v481_v36  ;;  %1682 = vmatmul.msk.f32.gmra.mxu0 %vm513_vm1, %v472_v40  ;;  %v2196_v36 = vld [vmem:[%s2416_s8] ss:$0 sm:$0xff] }
  0x47   : > { %1701 = vmatmul.msk.f32.gmra.mxu2 %vm670_vm2, %v489_v43  ;;  %1711 = vmatmul.msk.f32.gmra.mxu3 %vm670_vm2, %v499_v44 }
  0x49   : > { %1692 = vmatmul.msk.f32.gmra.mxu1 %vm513_vm1, %v482_v42  ;;  %1683 = vmatmul.msk.f32.gmra.mxu0 %vm513_vm1, %v473_v38 }
  0x4f   : > { %1702 = vmatmul.msk.f32.gmra.mxu2 %vm670_vm2, %v490_v46 }
  0x51   : > { %1693 = vmatmul.msk.f32.gmra.mxu1 %vm513_vm1, %v483_v45  ;;  %1684 = vmatmul.msk.f32.gmra.mxu0 %vm513_vm1, %v474_v35 }
  0x57   : > { %1703 = vmatmul.msk.f32.gmra.mxu2 %vm670_vm2, %v491_v48 }
  0x59   : > { %1694 = vmatmul.msk.f32.vlgmr.msrb.gmra.mxu1 %vm647_vm3, %v646_v47  ;;  %1685 = vmatmul.msk.f32.gmra.mxu0 %vm513_vm1, %v475_v34 }
  0x5f   : > { %1704 = vmatmul.msk.f32.gmra.mxu2 %vm670_vm2, %v492_v49 }
  0x61   : > { %1686 = vmatmul.msk.f32.gmra.mxu0 %vm513_vm1, %v476_v41 }
  0x67   : > { %1705 = vmatmul.msk.f32.gmra.mxu2 %vm670_vm2, %v493_v50 }
  0x9e   : > { %v2159_v51 = vpop.f32.mrf.mxu1  ;;  %v579_v52 = vpop.f32.mrf.mxu0 }
  0xa2   : > { %v740_v53 = vpop.f32.mrf.mxu2  ;;  %v2171_v4 = vpop.f32.mrf.mxu3 }
  0xa3   : > { %v741_v8 = vadd.f32 %v740_v53, %v579_v52 }
  0xa5   : > { %v792_v16 = vadd.f32 %v2178_v11, %v741_v8 }
  0xa6   : > { %v2161_v54 = vpop.f32.mrf.mxu1  ;;  %v582_v55 = vpop.f32.mrf.mxu0 }
  0xaa   : > { %v743_v56 = vpop.f32.mrf.mxu2  ;;  %v2180_v13 = vpop.f32.mrf.mxu3 }
  0xab   : > { %v744_v9 = vadd.f32 %v743_v56, %v582_v55 }
  0xad   : > { %v793_v17 = vadd.f32 %v2178_v11, %v744_v9 }
  0xae   : > { %v2163_v57 = vpop.f32.mrf.mxu1  ;;  %v585_v58 = vpop.f32.mrf.mxu0 }
  0xb2   : > { %v746_v59 = vpop.f32.mrf.mxu2  ;;  %v2191_v35 = vpop.f32.mrf.mxu3 }
  0xb3   : > { %v747_v14 = vadd.f32 %v746_v59, %v585_v58 }
  0xb5   : > { %v794_v22 = vadd.f32 %v2178_v11, %v747_v14 }
  0xb6   : > { %v2165_v60 = vpop.f32.mrf.mxu1  ;;  %v588_v61 = vpop.f32.mrf.mxu0 }
  0xba   : > { %v749_v62 = vpop.f32.mrf.mxu2 }
  0xbb   : > { %v750_v10 = vadd.f32 %v749_v62, %v588_v61  ;;  %v2207_v61 = vpop.f32.mrf.mxu3 }
  0xbd   : > { %v795_v18 = vadd.f32 %v2178_v11, %v750_v10 }
  0xbe   : > { %v2167_v63 = vpop.f32.mrf.mxu1  ;;  %v591_v0 = vpop.f32.mrf.mxu0 }
  0xc2   : > { %v752_v1 = vpop.f32.mrf.mxu2 }
  0xc3   : > { %v753_v15 = vadd.f32 %v752_v1, %v591_v0 }
  0xc5   : > { %v796_v23 = vadd.f32 %v2178_v11, %v753_v15 }
  0xc6   : > { %v2169_v2 = vpop.f32.mrf.mxu1  ;;  %v594_v3 = vpop.f32.mrf.mxu0 }
  0xca   : > { %v755_v5 = vpop.f32.mrf.mxu2 }
  0xcb   : > { %v756_v31 = vadd.f32 %v755_v5, %v594_v3 }
  0xcd   : > { %v797_v37 = vadd.f32 %v2178_v11, %v756_v31 }
  0xce   : > { %v2173_v6 = vpop.f32.mrf.mxu1  ;;  %v597_v7 = vpop.f32.mrf.mxu0 }
  0xd2   : > { %v758_v12 = vpop.f32.mrf.mxu2 }
  0xd3   : > { %v759_v33 = vadd.f32 %v758_v12, %v597_v7 }
  0xd5   : > { %v798_v39 = vadd.f32 %v2178_v11, %v759_v33 }
  0xd6   : > { %v2185_v19 = vpop.f32.mrf.mxu1  ;;  %v600_v24 = vpop.f32.mrf.mxu0 }
  0xd7   : > { %v809_v20 = vrot.slane %v2185_v19, 1  ;;  %v812_v21 = vperm.slane %v2185_v19, 0  ;;  %v810_v59 = vrot.slane %v2185_v19, 2 }
  0xd9   : > { %v813_v26 = vperm.slane %v809_v20, 0  ;;  %v820_v27 = vadd.f32 %v812_v21, %v792_v16  ;;  %v821_v28 = vadd.f32 %v812_v21, %v793_v17  ;;  %v823_v29 = vadd.f32 %v812_v21, %v795_v18 }
  0xda   : > { %v761_v30 = vpop.f32.mrf.mxu2  ;;  %v822_v32 = vadd.f32 %v812_v21, %v794_v22  ;;  %v814_v5 = vperm.slane %v810_v59, 0  ;;  %v771_v17 = vadd.f32 %v2171_v4, %v2161_v54  ;;  %v782_v21 = vpop.f32.mrf.mxu3  ;;  %v774_v4 = vadd.f32 %v2180_v13, %v2163_v57 }
  0xdb   : > { %1782 = vtanh.f32 %v820_v27  ;;  %v824_v34 = vadd.f32 %v813_v26, %v796_v23  ;;  %v762_v46 = vadd.f32 %v761_v30, %v600_v24  ;;  %v825_v49 = vadd.f32 %v813_v26, %v797_v37 }
  0xdc   : > { %1784 = vtanh.f32 %v821_v28  ;;  %v826_v53 = vadd.f32 %v813_v26, %v798_v39  ;;  %v802_v22 = vadd.f32 %v2178_v11, %v771_v17  ;;  %v811_v24 = vrot.slane %v2185_v19, 3 }
  0xdd   : > { %1786 = vtanh.f32 %v823_v29  ;;  %v799_v62 = vadd.f32 %v2178_v11, %v762_v46  ;;  %v777_v30 = vadd.f32 %v2191_v35, %v2165_v60  ;;  %v783_v60 = vadd.f32 %v782_v21, %v2169_v2 }
  0xde   : > { %1788 = vtanh.f32 %v822_v32  ;;  %v603_v41 = vpop.f32.mrf.mxu0  ;;  %v830_v27 = vadd.f32 %v814_v5, %v802_v22  ;;  %v815_v31 = vperm.slane %v811_v24, 0  ;;  %v803_v32 = vadd.f32 %v2178_v11, %v774_v4 }
  0xdf   : > { %1790 = vtanh.f32 %v824_v34  ;;  %v827_v8 = vadd.f32 %v813_v26, %v799_v62  ;;  %v1781_v26 = vld [vmem:[#allocation2] ss:$0 sm:$0xff]  ;;  %v804_v57 = vadd.f32 %v2178_v11, %v777_v30 }
  0xe0   : > { %1792 = vtanh.f32 %v825_v49  ;;  %v831_v34 = vadd.f32 %v814_v5, %v803_v32 }
  0xe1   : > { %v1783_v38 = vpop.eup %1782  ;;  %1794 = vtanh.f32 %v826_v53  ;;  %v780_v53 = vadd.f32 %v2207_v61, %v2167_v63 }
  0xe2   : > { %v1785_v40 = vpop.eup %1784  ;;  %v856_v42 = vmul.f32 %v1783_v38, %v2196_v36  ;;  %v764_v44 = vpop.f32.mrf.mxu2  ;;  %1796 = vtanh.f32 %v827_v8  ;;  %v832_v38 = vadd.f32 %v815_v31, %v804_v57 }
  0xe3   : > { %v1787_v43 = vpop.eup %1786  ;;  %v857_v45 = vmul.f32 %v1785_v40, %v2196_v36  ;;  %v765_v50 = vadd.f32 %v764_v44, %v603_v41  ;;  %v785_v13 = vpop.f32.mrf.mxu3  ;;  %v805_v62 = vadd.f32 %v2178_v11, %v780_v53 }
  0xe4   : > { %v872_v47 = vsel %vm513_vm1, %v856_v42, 0.0  ;;  %v859_v48 = vmul.f32 %v1787_v43, %v2196_v36  ;;  %v1789_v55 = vpop.eup %1788  ;;  %v786_v41 = vadd.f32 %v785_v13, %v2173_v6  ;;  %v806_v43 = vadd.f32 %v2178_v11, %v783_v60 }
  0xe5   : > { %873 = vadd.xlane.f32.xlu0 %v872_v47  ;;  %v875_v52 = vsel %vm513_vm1, %v857_v45, 0.0  ;;  %v1791_v58 = vpop.eup %1790  ;;  %v800_v0 = vadd.f32 %v2178_v11, %v765_v50  ;;  %v858_v1 = vmul.f32 %v1789_v55, %v2196_v36 }
  0xe6   : > { %876 = vadd.xlane.f32.xlu1 %v875_v52  ;;  %v881_v56 = vsel %vm513_vm1, %v859_v48, 0.0  ;;  %v860_v3 = vmul.f32 %v1791_v58, %v2196_v36  ;;  %v1793_v14 = vpop.eup %1792  ;;  %v807_v45 = vadd.f32 %v2178_v11, %v786_v41  ;;  %v834_v46 = vadd.f32 %v815_v31, %v806_v43 }
  0xe7   : > { %882 = vadd.xlane.f32.xlu2 %v881_v56  ;;  %v828_v10 = vadd.f32 %v814_v5, %v800_v0  ;;  %v878_v12 = vsel %vm513_vm1, %v858_v1, 0.0  ;;  %v1795_v16 = vpop.eup %1794  ;;  %v861_v20 = vmul.f32 %v1793_v14, %v2196_v36  ;;  %v833_v1 = vadd.f32 %v815_v31, %v805_v62 }
  0xe8   : > { %v884_v15 = vsel %vm513_vm1, %v860_v3, 0.0  ;;  %v1797_v54 = vpop.eup %1796  ;;  %v835_v47 = vadd.f32 %v815_v31, %v807_v45 }
  0xe9   : > { %1798 = vtanh.f32 %v828_v10  ;;  %v887_v25 = vsel %vm513_vm1, %v861_v20, 0.0  ;;  %v863_v19 = vmul.f32 %v1797_v54, %v2196_v36 }
  0xea   : > { %v767_v7 = vpop.f32.mrf.mxu2 }
  0xeb   : > { %v768_v9 = vadd.f32 %v767_v7, %v2159_v51  ;;  %v862_v51 = vmul.f32 %v1795_v16, %v2196_v36  ;;  %v893_v37 = vsel %vm513_vm1, %v863_v19, 0.0 }
  0xed   : > { %v801_v18 = vadd.f32 %v2178_v11, %v768_v9  ;;  %v890_v28 = vsel %vm513_vm1, %v862_v51, 0.0 }
  0xee   : > { %879 = vadd.xlane.f32.xlu1 %v878_v12 }
  0xef   : > { %885 = vadd.xlane.f32.xlu2 %v884_v15  ;;  %v829_v23 = vadd.f32 %v814_v5, %v801_v18  ;;  %v1799_v29 = vpop.eup %1798 }
  0xf0   : > { %v864_v33 = vmul.f32 %v1799_v29, %v2196_v36 }
  0xf1   : > { %1800 = vtanh.f32 %v829_v23 }
  0xf2   : > { %1802 = vtanh.f32 %v830_v27  ;;  %v896_v35 = vsel %vm513_vm1, %v864_v33, 0.0 }
  0xf3   : > { %1804 = vtanh.f32 %v831_v34 }
  0xf4   : > { %1806 = vtanh.f32 %v832_v38 }
  0xf5   : > { %1808 = vtanh.f32 %v834_v46 }
  0xf6   : > { %888 = vadd.xlane.f32.xlu1 %v887_v25  ;;  %1810 = vtanh.f32 %v835_v47 }
  0xf7   : > { %891 = vadd.xlane.f32.xlu2 %v890_v28  ;;  %v1801_v39 = vpop.eup %1800  ;;  %1812 = vtanh.f32 %v833_v1 }
  0xf8   : > { %v1803_v40 = vpop.eup %1802  ;;  %v865_v42 = vmul.f32 %v1801_v39, %v2196_v36 }
  0xf9   : > { %924 = vperm.xlu0 %1776, %v1781_v26   ;;  %v866_v44 = vmul.f32 %v1803_v40, %v2196_v36  ;;  %v1805_v48 = vpop.eup %1804 }
  0xfa   : > { %v899_v2 = vsel %vm513_vm1, %v865_v42, 0.0  ;;  %v1807_v6 = vpop.eup %1806  ;;  %v867_v50 = vmul.f32 %v1805_v48, %v2196_v36 }
  0xfb   : > { %v902_v49 = vsel %vm513_vm1, %v866_v44, 0.0  ;;  %v868_v52 = vmul.f32 %v1807_v6, %v2196_v36  ;;  %v1809_v56 = vpop.eup %1808 }
  0xfc   : > { %v905_v55 = vsel %vm513_vm1, %v867_v50, 0.0  ;;  %v1811_v59 = vpop.eup %1810  ;;  %v870_v0 = vmul.f32 %v1809_v56, %v2196_v36 }
  0xfd   : > { %v908_v58 = vsel %vm513_vm1, %v868_v52, 0.0  ;;  %v871_v3 = vmul.f32 %v1811_v59, %v2196_v36  ;;  %v1813_v61 = vpop.eup %1812 }
  0xfe   : > { %894 = vadd.xlane.f32.xlu1 %v893_v37  ;;  %v914_v5 = vsel %vm513_vm1, %v870_v0, 0.0  ;;  %v869_v7 = vmul.f32 %v1813_v61, %v2196_v36 }
  0xff   : > { %897 = vadd.xlane.f32.xlu2 %v896_v35  ;;  %v917_v63 = vsel %vm513_vm1, %v871_v3, 0.0 }
 0x100   : > { %v911_v8 = vsel %vm513_vm1, %v869_v7, 0.0 }
 0x106   : > { %900 = vadd.xlane.f32.xlu1 %v899_v2 }
 0x107   : > { %903 = vadd.xlane.f32.xlu2 %v902_v49 }
 0x10e   : > { %906 = vadd.xlane.f32.xlu1 %v905_v55 }
 0x10f   : > { %909 = vadd.xlane.f32.xlu2 %v908_v58 }
 0x116   : > { %915 = vadd.xlane.f32.xlu1 %v914_v5 }
 0x117   : > { %918 = vadd.xlane.f32.xlu2 %v917_v63 }
 0x123   : > { %912 = vadd.xlane.f32.xlu0 %v911_v8 }
 0x158   : > { %v874_v11 = vpop.xlane.xlu0 %873 }
 0x159   : > { %v877_v36 = vpop.xlane.xlu1 %876 }
 0x15a   : > { %v883_v39 = vpop.xlane.xlu2 %882 }
 0x161   : > { %v880_v29 = vpop.xlane.xlu1 %879 }
 0x162   : > { %v886_v47 = vpop.xlane.xlu2 %885 }
 0x169   : > { %v889_v62 = vpop.xlane.xlu1 %888 }
 0x16b   : > { %v2256_v9 = vpop.permute.xlu0 %924 }
 0x16c   : > { %v927_v10 = vadd.f32 %v2256_v9, %v874_v11  ;;  %v928_v51 = vadd.f32 %v2256_v9, %v877_v36  ;;  %v929_v30 = vadd.f32 %v2256_v9, %v880_v29  ;;  %v930_v60 = vadd.f32 %v2256_v9, %v883_v39 }
 0x16d   : > { %v931_v48 = vadd.f32 %v2256_v9, %v886_v47  ;;  %v932_v0 = vadd.f32 %v2256_v9, %v889_v62 }
 0x16e   : > { %v963_v12 = vperm.slane %v927_v10, 0  ;;  %v964_v14 = vperm.slane %v927_v10, 1  ;;  %v965_v15 = vperm.slane %v927_v10, 2  ;;  %v966_v16 = vperm.slane %v927_v10, 3 }
 0x16f   : > { %v967_v17 = vperm.slane %v927_v10, 4  ;;  %v968_v18 = vperm.slane %v927_v10, 5  ;;  %v969_v20 = vperm.slane %v927_v10, 6  ;;  %v970_v21 = vperm.slane %v927_v10, 7 }
 0x170   : > { %1091 = vst [vmem:[#allocation1] ss:$9 sm:$0xff] %v963_v12  ;;  %v971_v22 = vperm.slane %v928_v51, 0  ;;  %v972_v23 = vperm.slane %v928_v51, 1  ;;  %v973_v25 = vperm.slane %v928_v51, 2  ;;  %v974_v26 = vperm.slane %v928_v51, 3  ;;  %v892_v12 = vpop.xlane.xlu2 %891 }
 0x171   : > { %1093 = vst [vmem:[#allocation1 + $0x1] ss:$9 sm:$0xff] %v964_v14  ;;  %v975_v27 = vperm.slane %v928_v51, 4  ;;  %v976_v54 = vperm.slane %v928_v51, 5  ;;  %v977_v4 = vperm.slane %v928_v51, 6  ;;  %v978_v28 = vperm.slane %v928_v51, 7 }
 0x172   : > { %1095 = vst [vmem:[#allocation1 + $0x2] ss:$9 sm:$0xff] %v965_v15  ;;  %v979_v31 = vperm.slane %v929_v30, 0  ;;  %v980_v19 = vperm.slane %v929_v30, 1  ;;  %v981_v33 = vperm.slane %v929_v30, 2  ;;  %v982_v57 = vperm.slane %v929_v30, 3 }
 0x173   : > { %1097 = vst [vmem:[#allocation1 + $0x3] ss:$9 sm:$0xff] %v966_v16  ;;  %v983_v13 = vperm.slane %v929_v30, 4  ;;  %v984_v34 = vperm.slane %v929_v30, 5  ;;  %v985_v37 = vperm.slane %v929_v30, 6  ;;  %v986_v38 = vperm.slane %v929_v30, 7 }
 0x174   : > { %1099 = vst [vmem:[#allocation1 + $0x4] ss:$9 sm:$0xff] %v967_v17  ;;  %v987_v35 = vperm.slane %v930_v60, 0  ;;  %v988_v40 = vperm.slane %v930_v60, 1  ;;  %v989_v42 = vperm.slane %v930_v60, 2  ;;  %v990_v43 = vperm.slane %v930_v60, 3 }
 0x175   : > { %1101 = vst [vmem:[#allocation1 + $0x5] ss:$9 sm:$0xff] %v968_v18  ;;  %v991_v44 = vperm.slane %v930_v60, 4  ;;  %v992_v45 = vperm.slane %v930_v60, 5  ;;  %v993_v46 = vperm.slane %v930_v60, 6  ;;  %v994_v2 = vperm.slane %v930_v60, 7 }
 0x176   : > { %1103 = vst [vmem:[#allocation1 + $0x6] ss:$9 sm:$0xff] %v969_v20  ;;  %v995_v49 = vperm.slane %v931_v48, 0  ;;  %v996_v6 = vperm.slane %v931_v48, 1  ;;  %v997_v52 = vperm.slane %v931_v48, 2  ;;  %v998_v53 = vperm.slane %v931_v48, 3 }
 0x177   : > { %1105 = vst [vmem:[#allocation1 + $0x7] ss:$9 sm:$0xff] %v970_v21  ;;  %v999_v55 = vperm.slane %v931_v48, 4  ;;  %v1000_v56 = vperm.slane %v931_v48, 5  ;;  %v1001_v58 = vperm.slane %v931_v48, 6  ;;  %v1002_v59 = vperm.slane %v931_v48, 7 }
 0x178   : > { %v1003_v1 = vperm.slane %v932_v0, 0  ;;  %v1004_v3 = vperm.slane %v932_v0, 1  ;;  %v1005_v63 = vperm.slane %v932_v0, 2  ;;  %v1006_v61 = vperm.slane %v932_v0, 3 }
 0x179   : > { %v1007_v7 = vperm.slane %v932_v0, 4  ;;  %v1008_v8 = vperm.slane %v932_v0, 5  ;;  %v1009_v11 = vperm.slane %v932_v0, 6  ;;  %v1010_v10 = vperm.slane %v932_v0, 7 }
 0x17a   : > { %v933_v14 = vadd.f32 %v2256_v9, %v892_v12 }
 0x17c   : > { %v1011_v15 = vperm.slane %v933_v14, 0  ;;  %v1012_v16 = vperm.slane %v933_v14, 1  ;;  %v1013_v18 = vperm.slane %v933_v14, 2  ;;  %v1014_v20 = vperm.slane %v933_v14, 3 }
 0x17d   : > { %v1015_v21 = vperm.slane %v933_v14, 4  ;;  %v1016_v36 = vperm.slane %v933_v14, 5  ;;  %v1017_v51 = vperm.slane %v933_v14, 6 }
 0x17e   : > { %v1106_v24 = vld [vmem:[#allocation1] sm:$0xff] }
 0x17f   : > { %1107 = vst [vmem:[#allocation1] ss:$9 sm:$0xff] %v971_v22  ;;  %1243 = vperm.xlu1 %1777, %v1106_v24   ;;  %v1018_v22 = vperm.slane %v933_v14, 7 }
 0x180   : > { %1108 = vst [vmem:[#allocation1 + $0x1] ss:$9 sm:$0xff] %v972_v23  ;;  %v895_v23 = vpop.xlane.xlu1 %894 }
 0x181   : > { %1109 = vst [vmem:[#allocation1 + $0x2] ss:$9 sm:$0xff] %v973_v25  ;;  %v934_v24 = vadd.f32 %v2256_v9, %v895_v23 }
 0x182   : > { %1110 = vst [vmem:[#allocation1 + $0x3] ss:$9 sm:$0xff] %v974_v26 }
 0x183   : > { %1111 = vst [vmem:[#allocation1 + $0x4] ss:$9 sm:$0xff] %v975_v27  ;;  %v1019_v25 = vperm.slane %v934_v24, 0  ;;  %v1020_v27 = vperm.slane %v934_v24, 1  ;;  %v1024_v29 = vperm.slane %v934_v24, 5  ;;  %v1025_v30 = vperm.slane %v934_v24, 6 }
 0x184   : > { %1112 = vst [vmem:[#allocation1 + $0x5] ss:$9 sm:$0xff] %v976_v54  ;;  %v1021_v54 = vperm.slane %v934_v24, 2 }
 0x185   : > { %1113 = vst [vmem:[#allocation1 + $0x6] ss:$9 sm:$0xff] %v977_v4  ;;  %v1022_v4 = vperm.slane %v934_v24, 3 }
 0x186   : > { %1114 = vst [vmem:[#allocation1 + $0x7] ss:$9 sm:$0xff] %v978_v28  ;;  %v1023_v28 = vperm.slane %v934_v24, 4 }
 0x18d   : > { %v1115_v32 = vld [vmem:[#allocation1] sm:$0xff] }
 0x18e   : > { %1116 = vst [vmem:[#allocation1] ss:$9 sm:$0xff] %v979_v31  ;;  %1246 = vperm.xlu2 %1778, %v1115_v32   ;;  %v1026_v31 = vperm.slane %v934_v24, 7 }
 0x18f   : > { %1117 = vst [vmem:[#allocation1 + $0x1] ss:$9 sm:$0xff] %v980_v19  ;;  %v898_v19 = vpop.xlane.xlu2 %897 }
 0x190   : > { %1118 = vst [vmem:[#allocation1 + $0x2] ss:$9 sm:$0xff] %v981_v33  ;;  %v935_v32 = vadd.f32 %v2256_v9, %v898_v19 }
 0x191   : > { %1119 = vst [vmem:[#allocation1 + $0x3] ss:$9 sm:$0xff] %v982_v57 }
 0x192   : > { %1120 = vst [vmem:[#allocation1 + $0x4] ss:$9 sm:$0xff] %v983_v13  ;;  %v1027_v33 = vperm.slane %v935_v32, 0  ;;  %v1028_v13 = vperm.slane %v935_v32, 1  ;;  %v1032_v39 = vperm.slane %v935_v32, 5  ;;  %v1033_v60 = vperm.slane %v935_v32, 6 }
 0x193   : > { %1121 = vst [vmem:[#allocation1 + $0x5] ss:$9 sm:$0xff] %v984_v34  ;;  %v1029_v34 = vperm.slane %v935_v32, 2 }
 0x194   : > { %1122 = vst [vmem:[#allocation1 + $0x6] ss:$9 sm:$0xff] %v985_v37  ;;  %v1030_v37 = vperm.slane %v935_v32, 3 }
 0x195   : > { %1123 = vst [vmem:[#allocation1 + $0x7] ss:$9 sm:$0xff] %v986_v38  ;;  %v1031_v38 = vperm.slane %v935_v32, 4 }
 0x19c   : > { %v1124_v41 = vld [vmem:[#allocation1] sm:$0xff] }
 0x19d   : > { %1125 = vst [vmem:[#allocation1] ss:$9 sm:$0xff] %v987_v35  ;;  %1249 = vperm.xlu1 %1777, %v1124_v41   ;;  %v1034_v35 = vperm.slane %v935_v32, 7 }
 0x19e   : > { %1126 = vst [vmem:[#allocation1 + $0x1] ss:$9 sm:$0xff] %v988_v40  ;;  %v901_v40 = vpop.xlane.xlu1 %900 }
 0x19f   : > { %1127 = vst [vmem:[#allocation1 + $0x2] ss:$9 sm:$0xff] %v989_v42  ;;  %v936_v41 = vadd.f32 %v2256_v9, %v901_v40 }
 0x1a0   : > { %1128 = vst [vmem:[#allocation1 + $0x3] ss:$9 sm:$0xff] %v990_v43 }
 0x1a1   : > { %1129 = vst [vmem:[#allocation1 + $0x4] ss:$9 sm:$0xff] %v991_v44  ;;  %v1035_v42 = vperm.slane %v936_v41, 0  ;;  %v1036_v44 = vperm.slane %v936_v41, 1  ;;  %v1040_v47 = vperm.slane %v936_v41, 5  ;;  %v1041_v48 = vperm.slane %v936_v41, 6 }
 0x1a2   : > { %1130 = vst [vmem:[#allocation1 + $0x5] ss:$9 sm:$0xff] %v992_v45  ;;  %v1037_v45 = vperm.slane %v936_v41, 2 }
 0x1a3   : > { %1131 = vst [vmem:[#allocation1 + $0x6] ss:$9 sm:$0xff] %v993_v46  ;;  %v1038_v46 = vperm.slane %v936_v41, 3 }
 0x1a4   : > { %1132 = vst [vmem:[#allocation1 + $0x7] ss:$9 sm:$0xff] %v994_v2  ;;  %v1039_v2 = vperm.slane %v936_v41, 4 }
 0x1ab   : > { %v1133_v50 = vld [vmem:[#allocation1] sm:$0xff] }
 0x1ac   : > { %1134 = vst [vmem:[#allocation1] ss:$9 sm:$0xff] %v995_v49  ;;  %1252 = vperm.xlu2 %1778, %v1133_v50   ;;  %v1042_v49 = vperm.slane %v936_v41, 7 }
 0x1ad   : > { %1135 = vst [vmem:[#allocation1 + $0x1] ss:$9 sm:$0xff] %v996_v6  ;;  %v904_v6 = vpop.xlane.xlu2 %903 }
 0x1ae   : > { %1136 = vst [vmem:[#allocation1 + $0x2] ss:$9 sm:$0xff] %v997_v52  ;;  %v937_v50 = vadd.f32 %v2256_v9, %v904_v6 }
 0x1af   : > { %1137 = vst [vmem:[#allocation1 + $0x3] ss:$9 sm:$0xff] %v998_v53 }
 0x1b0   : > { %1138 = vst [vmem:[#allocation1 + $0x4] ss:$9 sm:$0xff] %v999_v55  ;;  %v1043_v52 = vperm.slane %v937_v50, 0  ;;  %v1044_v55 = vperm.slane %v937_v50, 1  ;;  %v1048_v62 = vperm.slane %v937_v50, 5  ;;  %v1049_v0 = vperm.slane %v937_v50, 6 }
 0x1b1   : > { %1139 = vst [vmem:[#allocation1 + $0x5] ss:$9 sm:$0xff] %v1000_v56  ;;  %v1045_v56 = vperm.slane %v937_v50, 2 }
 0x1b2   : > { %1140 = vst [vmem:[#allocation1 + $0x6] ss:$9 sm:$0xff] %v1001_v58  ;;  %v1046_v58 = vperm.slane %v937_v50, 3 }
 0x1b3   : > { %1141 = vst [vmem:[#allocation1 + $0x7] ss:$9 sm:$0xff] %v1002_v59  ;;  %v1047_v59 = vperm.slane %v937_v50, 4 }
 0x1ba   : > { %v1142_v5 = vld [vmem:[#allocation1] sm:$0xff] }
 0x1bb   : > { %1143 = vst [vmem:[#allocation1] ss:$9 sm:$0xff] %v1003_v1  ;;  %1255 = vperm.xlu2 %1778, %v1142_v5   ;;  %v1050_v1 = vperm.slane %v937_v50, 7 }
 0x1bc   : > { %1144 = vst [vmem:[#allocation1 + $0x1] ss:$9 sm:$0xff] %v1004_v3  ;;  %v907_v3 = vpop.xlane.xlu1 %906 }
 0x1bd   : > { %1145 = vst [vmem:[#allocation1 + $0x2] ss:$9 sm:$0xff] %v1005_v63  ;;  %v938_v5 = vadd.f32 %v2256_v9, %v907_v3 }
 0x1be   : > { %1146 = vst [vmem:[#allocation1 + $0x3] ss:$9 sm:$0xff] %v1006_v61 }
 0x1bf   : > { %1147 = vst [vmem:[#allocation1 + $0x4] ss:$9 sm:$0xff] %v1007_v7  ;;  %v1051_v63 = vperm.slane %v938_v5, 0  ;;  %v1052_v7 = vperm.slane %v938_v5, 1  ;;  %v1056_v12 = vperm.slane %v938_v5, 5  ;;  %v1057_v14 = vperm.slane %v938_v5, 6 }
 0x1c0   : > { %1148 = vst [vmem:[#allocation1 + $0x5] ss:$9 sm:$0xff] %v1008_v8  ;;  %v1053_v8 = vperm.slane %v938_v5, 2 }
 0x1c1   : > { %1149 = vst [vmem:[#allocation1 + $0x6] ss:$9 sm:$0xff] %v1009_v11  ;;  %v1054_v11 = vperm.slane %v938_v5, 3 }
 0x1c2   : > { %1150 = vst [vmem:[#allocation1 + $0x7] ss:$9 sm:$0xff] %v1010_v10  ;;  %v1055_v10 = vperm.slane %v938_v5, 4 }
 0x1c9   : > { %v1151_v17 = vld [vmem:[#allocation1] sm:$0xff] }
 0x1ca   : > { %1152 = vst [vmem:[#allocation1] ss:$9 sm:$0xff] %v1011_v15  ;;  %1258 = vperm.xlu1 %1777, %v1151_v17   ;;  %v1058_v15 = vperm.slane %v938_v5, 7 }
 0x1cb   : > { %1153 = vst [vmem:[#allocation1 + $0x1] ss:$9 sm:$0xff] %v1012_v16  ;;  %v910_v16 = vpop.xlane.xlu2 %909 }
 0x1cc   : > { %1154 = vst [vmem:[#allocation1 + $0x2] ss:$9 sm:$0xff] %v1013_v18  ;;  %v939_v17 = vadd.f32 %v2256_v9, %v910_v16 }
 0x1cd   : > { %1155 = vst [vmem:[#allocation1 + $0x3] ss:$9 sm:$0xff] %v1014_v20 }
 0x1ce   : > { %1156 = vst [vmem:[#allocation1 + $0x4] ss:$9 sm:$0xff] %v1015_v21  ;;  %v1059_v18 = vperm.slane %v939_v17, 0  ;;  %v1060_v21 = vperm.slane %v939_v17, 1  ;;  %v1064_v23 = vperm.slane %v939_v17, 5  ;;  %v1065_v24 = vperm.slane %v939_v17, 6 }
 0x1cf   : > { %1157 = vst [vmem:[#allocation1 + $0x5] ss:$9 sm:$0xff] %v1016_v36  ;;  %v1061_v36 = vperm.slane %v939_v17, 2 }
 0x1d0   : > { %1158 = vst [vmem:[#allocation1 + $0x6] ss:$9 sm:$0xff] %v1017_v51  ;;  %v1062_v51 = vperm.slane %v939_v17, 3 }
 0x1d1   : > { %1159 = vst [vmem:[#allocation1 + $0x7] ss:$9 sm:$0xff] %v1018_v22  ;;  %v1063_v22 = vperm.slane %v939_v17, 4 }
 0x1d3   : > { %v919_v41 = vpop.xlane.xlu2 %918 }
 0x1d8   : > { %v1160_v26 = vld [vmem:[#allocation1] sm:$0xff] }
 0x1d9   : > { %1161 = vst [vmem:[#allocation1] ss:$9 sm:$0xff] %v1019_v25  ;;  %1261 = vperm.xlu2 %1778, %v1160_v26   ;;  %v1066_v25 = vperm.slane %v939_v17, 7  ;;  %v913_v26 = vpop.xlane.xlu0 %912 }
 0x1da   : > { %1162 = vst [vmem:[#allocation1 + $0x1] ss:$9 sm:$0xff] %v1020_v27  ;;  %v940_v27 = vadd.f32 %v2256_v9, %v913_v26 }
 0x1db   : > { %1163 = vst [vmem:[#allocation1 + $0x2] ss:$9 sm:$0xff] %v1021_v54 }
 0x1dc   : > { %1164 = vst [vmem:[#allocation1 + $0x3] ss:$9 sm:$0xff] %v1022_v4  ;;  %v1067_v54 = vperm.slane %v940_v27, 0  ;;  %v1072_v19 = vperm.slane %v940_v27, 5  ;;  %v1073_v32 = vperm.slane %v940_v27, 6 }
 0x1dd   : > { %1165 = vst [vmem:[#allocation1 + $0x4] ss:$9 sm:$0xff] %v1023_v28  ;;  %v1068_v28 = vperm.slane %v940_v27, 1 }
 0x1de   : > { %1166 = vst [vmem:[#allocation1 + $0x5] ss:$9 sm:$0xff] %v1024_v29  ;;  %v1069_v29 = vperm.slane %v940_v27, 2 }
 0x1df   : > { %1167 = vst [vmem:[#allocation1 + $0x6] ss:$9 sm:$0xff] %v1025_v30  ;;  %v1070_v30 = vperm.slane %v940_v27, 3 }
 0x1e0   : > { %1168 = vst [vmem:[#allocation1 + $0x7] ss:$9 sm:$0xff] %v1026_v31  ;;  %v1071_v31 = vperm.slane %v940_v27, 4 }
 0x1e7   : > { %v2267_v57 = vld [vmem:[#allocation1] sm:$0xff] }
 0x1e8   : > { %1170 = vst [vmem:[#allocation1] ss:$9 sm:$0xff] %v1027_v33  ;;  %v1074_v33 = vperm.slane %v940_v27, 7  ;;  %v505_v27 = vld [vmem:[%s2297_s13 + $0x1] sm:$0x1] }
 0x1e9   : > { %1171 = vst [vmem:[#allocation1 + $0x1] ss:$9 sm:$0xff] %v1028_v13  ;;  %vm944_vm8 = vcmp.gt.f32.partialorder %v505_v27, 0.0 }
 0x1ea   : > { %1172 = vst [vmem:[#allocation1 + $0x2] ss:$9 sm:$0xff] %v1029_v34 }
 0x1eb   : > { %1173 = vst [vmem:[#allocation1 + $0x3] ss:$9 sm:$0xff] %v1030_v37 }
 0x1ec   : > { %1174 = vst [vmem:[#allocation1 + $0x4] ss:$9 sm:$0xff] %v1031_v38 }
 0x1ed   : > { %1175 = vst [vmem:[#allocation1 + $0x5] ss:$9 sm:$0xff] %v1032_v39 }
 0x1ee   : > { %1176 = vst [vmem:[#allocation1 + $0x6] ss:$9 sm:$0xff] %v1033_v60 }
 0x1ef   : > { %1177 = vst [vmem:[#allocation1 + $0x7] ss:$9 sm:$0xff] %v1034_v35 }
 0x1f6   : > { %v1178_v43 = vld [vmem:[#allocation1] sm:$0xff] }
 0x1f7   : > { %1179 = vst [vmem:[#allocation1] ss:$9 sm:$0xff] %v1035_v42  ;;  %1267 = vperm.xlu2 %1778, %v1178_v43  }
 0x1f8   : > { %1180 = vst [vmem:[#allocation1 + $0x1] ss:$9 sm:$0xff] %v1036_v44  ;;  %v1290_v44 = vlaneseq }
 0x1f9   : > { %1181 = vst [vmem:[#allocation1 + $0x2] ss:$9 sm:$0xff] %v1037_v45 }
 0x1fa   : > { %1182 = vst [vmem:[#allocation1 + $0x3] ss:$9 sm:$0xff] %v1038_v46  ;;  %v942_v46 = vadd.f32 %v2256_v9, %v919_v41 }
 0x1fb   : > { %1183 = vst [vmem:[#allocation1 + $0x4] ss:$9 sm:$0xff] %v1039_v2  ;;  %v2279_v2 = vand.u32 127, %v1290_v44 }
 0x1fc   : > { %1184 = vst [vmem:[#allocation1 + $0x5] ss:$9 sm:$0xff] %v1040_v47  ;;  %v1247_v47 = vpop.permute.xlu2 %1246  ;;  %v1084_v6 = vperm.slane %v942_v46, 1  ;;  %v1089_v3 = vperm.slane %v942_v46, 6 }
 0x1fd   : > { %1185 = vst [vmem:[#allocation1 + $0x6] ss:$9 sm:$0xff] %v1041_v48  ;;  %v1083_v48 = vperm.slane %v942_v46, 0  ;;  %v2285_v50 = vadd.s32 4294967288, %v2279_v2 }
 0x1fe   : > { %1186 = vst [vmem:[#allocation1 + $0x7] ss:$9 sm:$0xff] %v1042_v49  ;;  %v2282_v49 = vadd.s32 4294967280, %v2279_v2 }
 0x205   : > { %v1187_v53 = vld [vmem:[#allocation1] sm:$0xff] }
 0x206   : > { %1188 = vst [vmem:[#allocation1] ss:$9 sm:$0xff] %v1043_v52  ;;  %1270 = vperm.xlu1 %1777, %v1187_v53   ;;  %v1253_v5 = vpop.permute.xlu2 %1252 }
 0x207   : > { %1189 = vst [vmem:[#allocation1 + $0x1] ss:$9 sm:$0xff] %v1044_v55  ;;  %v1085_v55 = vperm.slane %v942_v46, 2 }
 0x208   : > { %1190 = vst [vmem:[#allocation1 + $0x2] ss:$9 sm:$0xff] %v1045_v56  ;;  %v1086_v56 = vperm.slane %v942_v46, 3 }
 0x209   : > { %1191 = vst [vmem:[#allocation1 + $0x3] ss:$9 sm:$0xff] %v1046_v58  ;;  %v1087_v58 = vperm.slane %v942_v46, 4 }
 0x20a   : > { %1192 = vst [vmem:[#allocation1 + $0x4] ss:$9 sm:$0xff] %v1047_v59 }
 0x20b   : > { %1193 = vst [vmem:[#allocation1 + $0x5] ss:$9 sm:$0xff] %v1048_v62  ;;  %v1088_v62 = vperm.slane %v942_v46, 5 }
 0x20c   : > { %1194 = vst [vmem:[#allocation1 + $0x6] ss:$9 sm:$0xff] %v1049_v0  ;;  %v1294_v0 = vperm.slane %v1247_v47, %v2285_v50 }
 0x20d   : > { %1195 = vst [vmem:[#allocation1 + $0x7] ss:$9 sm:$0xff] %v1050_v1  ;;  %v2291_v1 = vadd.s32 4294967272, %v2279_v2 }
 0x214   : > { %v1196_v61 = vld [vmem:[#allocation1] sm:$0xff] }
 0x215   : > { %1197 = vst [vmem:[#allocation1] ss:$9 sm:$0xff] %v1051_v63  ;;  %1273 = vperm.xlu1 %1777, %v1196_v61   ;;  %v1090_v63 = vperm.slane %v942_v46, 7 }
 0x216   : > { %1198 = vst [vmem:[#allocation1 + $0x1] ss:$9 sm:$0xff] %v1052_v7  ;;  %v504_v7 = vld [vmem:[%s2297_s13] sm:$0x1] }
 0x217   : > { %1199 = vst [vmem:[#allocation1 + $0x2] ss:$9 sm:$0xff] %v1053_v8  ;;  %vm943_vm7 = vcmp.gt.f32.partialorder %v504_v7, 0.0 }
 0x218   : > { %1200 = vst [vmem:[#allocation1 + $0x3] ss:$9 sm:$0xff] %v1054_v11  ;;  %v1302_v11 = vperm.slane %v1253_v5, %v2291_v1 }
 0x219   : > { %1201 = vst [vmem:[#allocation1 + $0x4] ss:$9 sm:$0xff] %v1055_v10 }
 0x21a   : > { %1202 = vst [vmem:[#allocation1 + $0x5] ss:$9 sm:$0xff] %v1056_v12 }
 0x21b   : > { %1203 = vst [vmem:[#allocation1 + $0x6] ss:$9 sm:$0xff] %v1057_v14 }
 0x21c   : > { %1204 = vst [vmem:[#allocation1 + $0x7] ss:$9 sm:$0xff] %v1058_v15  ;;  %v1256_v15 = vpop.permute.xlu2 %1255 }
 0x21d   : > { %1264 = vperm.xlu1 %1777, %v2267_v57   ;;  %v916_v57 = vpop.xlane.xlu1 %915  ;;  %v1305_v26 = vperm.slane %v1256_v15, %v2279_v2 }
 0x21e   : > { %v941_v13 = vadd.f32 %v2256_v9, %v916_v57 }
 0x220   : > { %v1075_v34 = vperm.slane %v941_v13, 0  ;;  %v1076_v37 = vperm.slane %v941_v13, 1  ;;  %v1077_v39 = vperm.slane %v941_v13, 2  ;;  %v1078_v60 = vperm.slane %v941_v13, 3 }
 0x221   : > { %v1079_v35 = vperm.slane %v941_v13, 4  ;;  %v1080_v40 = vperm.slane %v941_v13, 5  ;;  %v1081_v42 = vperm.slane %v941_v13, 6  ;;  %v1082_v43 = vperm.slane %v941_v13, 7 }
 0x223   : > { %v2274_v20 = vld [vmem:[#allocation1] sm:$0xff] }
 0x224   : > { %1206 = vst [vmem:[#allocation1] ss:$9 sm:$0xff] %v1059_v18 }
 0x225   : > { %1207 = vst [vmem:[#allocation1 + $0x1] ss:$9 sm:$0xff] %v1060_v21  ;;  %v1244_v45 = vpop.permute.xlu1 %1243 }
 0x226   : > { %1208 = vst [vmem:[#allocation1 + $0x2] ss:$9 sm:$0xff] %v1061_v36  ;;  %v1292_v9 = vperm.slane %v1244_v45, %v2279_v2 }
 0x227   : > { %1209 = vst [vmem:[#allocation1 + $0x3] ss:$9 sm:$0xff] %v1062_v51 }
 0x228   : > { %1210 = vst [vmem:[#allocation1 + $0x4] ss:$9 sm:$0xff] %v1063_v22  ;;  %v1296_v61 = vsel %vm1295_vm4, %v1294_v0, %v1292_v9 }
 0x229   : > { %1211 = vst [vmem:[#allocation1 + $0x5] ss:$9 sm:$0xff] %v1064_v23 }
 0x22a   : > { %1212 = vst [vmem:[#allocation1 + $0x6] ss:$9 sm:$0xff] %v1065_v24 }
 0x22b   : > { %1213 = vst [vmem:[#allocation1 + $0x7] ss:$9 sm:$0xff] %v1066_v25 }
 0x22d   : > { %v1250_v53 = vpop.permute.xlu1 %1249 }
 0x22e   : > { %v1298_v59 = vperm.slane %v1250_v53, %v2282_v49 }
 0x230   : > { %v1300_v8 = vsel %vm1299_vm5, %v1298_v59, %v1296_v61 }
 0x231   : > { %v1304_v10 = vsel %vm1303_vm6, %v1302_v11, %v1300_v8 }
 0x232   : > { %v1214_v4 = vld [vmem:[#allocation1] sm:$0xff]  ;;  %v1330_v12 = vsel %vm943_vm7, -inf, %v1304_v10 }
 0x233   : > { %1215 = vst [vmem:[#allocation1] ss:$9 sm:$0xff] %v1067_v54  ;;  %1279 = vperm.xlu0 %1776, %v1214_v4   ;;  %v1262_v17 = vpop.permute.xlu2 %1261 }
 0x234   : > { %1216 = vst [vmem:[#allocation1 + $0x1] ss:$9 sm:$0xff] %v1068_v28  ;;  %v1308_v4 = vperm.slane %v1262_v17, %v2282_v49 }
 0x235   : > { %1217 = vst [vmem:[#allocation1 + $0x2] ss:$9 sm:$0xff] %v1069_v29 }
 0x236   : > { %1218 = vst [vmem:[#allocation1 + $0x3] ss:$9 sm:$0xff] %v1070_v30 }
 0x237   : > { %1219 = vst [vmem:[#allocation1 + $0x4] ss:$9 sm:$0xff] %v1071_v31 }
 0x238   : > { %1220 = vst [vmem:[#allocation1 + $0x5] ss:$9 sm:$0xff] %v1072_v19 }
 0x239   : > { %1221 = vst [vmem:[#allocation1 + $0x6] ss:$9 sm:$0xff] %v1073_v32 }
 0x23a   : > { %1222 = vst [vmem:[#allocation1 + $0x7] ss:$9 sm:$0xff] %v1074_v33 }
 0x23c   : > { %v1259_v16 = vpop.permute.xlu1 %1258 }
 0x23d   : > { %v1306_v24 = vperm.slane %v1259_v16, %v2285_v50 }
 0x23f   : > { %v1307_v54 = vsel %vm1295_vm4, %v1306_v24, %v1305_v26 }
 0x240   : > { %v1309_v30 = vsel %vm1299_vm5, %v1308_v4, %v1307_v54 }
 0x241   : > { %v1223_v38 = vld [vmem:[#allocation1] sm:$0xff] }
 0x242   : > { %1282 = vperm.xlu2 %1778, %v1223_v38   ;;  %1224 = vst [vmem:[#allocation1] ss:$9 sm:$0xff] %v1075_v34  ;;  %v507_v34 = vld [vmem:[%s2297_s13 + $0x3] sm:$0x1] }
 0x243   : > { %1225 = vst [vmem:[#allocation1 + $0x1] ss:$9 sm:$0xff] %v1076_v37  ;;  %vm946_vm9 = vcmp.gt.f32.partialorder %v507_v34, 0.0 }
 0x244   : > { %1226 = vst [vmem:[#allocation1 + $0x2] ss:$9 sm:$0xff] %v1077_v39 }
 0x245   : > { %1227 = vst [vmem:[#allocation1 + $0x3] ss:$9 sm:$0xff] %v1078_v60 }
 0x246   : > { %1228 = vst [vmem:[#allocation1 + $0x4] ss:$9 sm:$0xff] %v1079_v35 }
 0x247   : > { %1229 = vst [vmem:[#allocation1 + $0x5] ss:$9 sm:$0xff] %v1080_v40 }
 0x248   : > { %1230 = vst [vmem:[#allocation1 + $0x6] ss:$9 sm:$0xff] %v1081_v42 }
 0x249   : > { %1231 = vst [vmem:[#allocation1 + $0x7] ss:$9 sm:$0xff] %v1082_v43  ;;  %v506_v43 = vld [vmem:[%s2297_s13 + $0x2] sm:$0x1]  ;;  %s1844_s13 = scalar_lea.hbm %s1843_s30, 4 }
 0x24a   : > { %vm945_vm10 = vcmp.gt.f32.partialorder %v506_v43, 0.0  ;;  %p1845_p11 = scmp.ne.s32.totalorder %s1843_s30, %s1844_s13  ;;  %p1850_p1 = scmp.lt.s32.totalorder %s1848_s0, %s1844_s13 }
 0x24c   : > { %p1846_p12 = pnand %p1845_p11, %p2025_p5  ;;  %p1851_p2 = por %p1850_p1, %p1849_p0 }
 0x24e   : > { %p1847_p13 = pneg %p1846_p12 }
 0x250   : > { %v1232_v52 = vld [vmem:[#allocation1] sm:$0xff]  ;;  %p1852_p3 = pnand %p1851_p2, %p1847_p13 }
 0x251   : > { %1285 = vperm.xlu0 %1776, %v1232_v52   ;;  %1233 = vst [vmem:[#allocation1] ss:$9 sm:$0xff] %v1083_v48  ;;  %v1268_v21 = vpop.permute.xlu2 %1267 }
 0x252   : > { %1234 = vst [vmem:[#allocation1 + $0x1] ss:$9 sm:$0xff] %v1084_v6  ;;  %v1312_v51 = vperm.slane %v1268_v21, %v2279_v2 }
 0x253   : > { %1235 = vst [vmem:[#allocation1 + $0x2] ss:$9 sm:$0xff] %v1085_v55 }
 0x254   : > { %1236 = vst [vmem:[#allocation1 + $0x3] ss:$9 sm:$0xff] %v1086_v56 }
 0x255   : > { %1237 = vst [vmem:[#allocation1 + $0x4] ss:$9 sm:$0xff] %v1087_v58 }
 0x256   : > { %1238 = vst [vmem:[#allocation1 + $0x5] ss:$9 sm:$0xff] %v1088_v62 }
 0x257   : > { %1239 = vst [vmem:[#allocation1 + $0x6] ss:$9 sm:$0xff] %v1089_v3 }
 0x258   : > { %1240 = vst [vmem:[#allocation1 + $0x7] ss:$9 sm:$0xff] %v1090_v63 }
 0x259   : > { %1276 = vperm.xlu0 %1776, %v2274_v20  }
 0x25f   : > { %v1241_v14 = vld [vmem:[#allocation1] sm:$0xff] }
 0x260   : > { %1288 = vperm.xlu2 %1778, %v1241_v14   ;;  %1338 = vst [vmem:[#allocation1] ss:$9 sm:$0xff] %v1330_v12 }
 0x278   : > { %v1271_v18 = vpop.permute.xlu1 %1270 }
 0x279   : > { %v1313_v36 = vperm.slane %v1271_v18, %v2285_v50 }
 0x27b   : > { %v1314_v23 = vsel %vm1295_vm4, %v1313_v36, %v1312_v51  ;;  %v1824_v51 = vld [vmem:[%s2067_s4 + $0x78] sm:$0xff] }
 0x287   : > { %v1274_v22 = vpop.permute.xlu1 %1273 }
 0x288   : > { %v1315_v20 = vperm.slane %v1274_v22, %v2282_v49  ;;  %v1825_v22 = vld [vmem:[%s2067_s4 + $0x70] sm:$0xff] }
 0x28a   : > { %v1316_v25 = vsel %vm1299_vm5, %v1315_v20, %v1314_v23  ;;  %v1826_v20 = vld [vmem:[%s2067_s4 + $0x68] sm:$0xff]  ;;  %v1827_v23 = vld [vmem:[%s2067_s4 + $0x60] sm:$0xff] }
 0x28f   : > { %v1265_v28 = vpop.permute.xlu1 %1264 }
 0x290   : > { %v1310_v29 = vperm.slane %v1265_v28, %v2291_v1 }
 0x292   : > { %v1311_v31 = vsel %vm1303_vm6, %v1310_v29, %v1309_v30 }
 0x293   : > { %v1331_v19 = vsel %vm944_vm8, -inf, %v1311_v31 }
 0x294   : > { %1340 = vst [vmem:[#allocation1 + $0x1] ss:$9 sm:$0xff] %v1331_v19 }
 0x29c   : > { %v1283_v32 = vpop.permute.xlu2 %1282 }
 0x29d   : > { %v1320_v37 = vperm.slane %v1283_v32, %v2285_v50 }
 0x2a5   : > { %v1280_v33 = vpop.permute.xlu0 %1279 }
 0x2a6   : > { %v1319_v57 = vperm.slane %v1280_v33, %v2279_v2 }
 0x2a8   : > { %v1321_v60 = vsel %vm1295_vm4, %v1320_v37, %v1319_v57 }
 0x2ba   : > { %v1289_v13 = vpop.permute.xlu2 %1288 }
 0x2bb   : > { %v1324_v35 = vperm.slane %v1289_v13, %v2291_v1 }
 0x2c3   : > { %v1286_v38 = vpop.permute.xlu0 %1285 }
 0x2c4   : > { %v1322_v39 = vperm.slane %v1286_v38, %v2282_v49 }
 0x2c6   : > { %v1323_v40 = vsel %vm1299_vm5, %v1322_v39, %v1321_v60 }
 0x2c7   : > { %v1325_v41 = vsel %vm1303_vm6, %v1324_v35, %v1323_v40 }
 0x2c8   : > { %v1333_v42 = vsel %vm946_vm9, -inf, %v1325_v41 }
 0x2c9   : > { %1344 = vst [vmem:[#allocation1 + $0x3] ss:$9 sm:$0xff] %v1333_v42 }
 0x2cb   : > { %v1277_v44 = vpop.permute.xlu0 %1276 }
 0x2cc   : > { %v1317_v45 = vperm.slane %v1277_v44, %v2291_v1 }
 0x2ce   : > { %v1318_v46 = vsel %vm1303_vm6, %v1317_v45, %v1316_v25 }
 0x2cf   : > { %v1332_v2 = vsel %vm945_vm10, -inf, %v1318_v46 }
 0x2d0   : > { %1342 = vst [vmem:[#allocation1 + $0x2] ss:$9 sm:$0xff] %v1332_v2 }
 0x2d7   : > { %v1345_v47 = vld [vmem:[#allocation1] sm:$0xff] }
 0x2d8   : > { %v1348_v48 = vsel %vm1347_vm11, %v1345_v47, -inf }
 0x2d9   : > { %1349 = vmax.xlane.f32.xlu1 %v1348_v48 }
 0x34c   : > { %v1350_v49 = vpop.xlane.xlu1 %1349 }
 0x34d   : > { %v1352_v6 = vperm.slane %v1350_v49, 0  ;;  %v1353_v50 = vperm.slane %v1350_v49, 1  ;;  %v1354_v52 = vperm.slane %v1350_v49, 2  ;;  %v1355_v53 = vperm.slane %v1350_v49, 3 }
 0x34f   : > { %v1360_v55 = vsub.f32 %v1330_v12, %v1352_v6  ;;  %v1361_v56 = vsub.f32 %v1331_v19, %v1353_v50  ;;  %v1362_v9 = vsub.f32 %v1332_v2, %v1354_v52  ;;  %v1363_v58 = vsub.f32 %v1333_v42, %v1355_v53 }
 0x351   : > { %v1364_v59 = vmul.f32 1.442695, %v1360_v55  ;;  %v1366_v62 = vmul.f32 1.442695, %v1361_v56  ;;  %v1368_v0 = vmul.f32 1.442695, %v1362_v9 }
 0x352   : > { %v1370_v1 = vmul.f32 1.442695, %v1363_v58 }
 0x353   : > { %1814 = vpow2.f32 %v1364_v59 }
 0x354   : > { %1816 = vpow2.f32 %v1366_v62 }
 0x355   : > { %1818 = vpow2.f32 %v1368_v0 }
 0x356   : > { %1820 = vpow2.f32 %v1370_v1 }
 0x359   : > { %v1815_v3 = vpop.eup %1814 }
 0x35a   : > { %v1817_v5 = vpop.eup %1816  ;;  %1376 = vst [vmem:[#allocation1] ss:$9 sm:$0xff] %v1815_v3 }
 0x35b   : > { %v1819_v63 = vpop.eup %1818  ;;  %1378 = vst [vmem:[#allocation1 + $0x1] ss:$9 sm:$0xff] %v1817_v5 }
 0x35c   : > { %v1821_v61 = vpop.eup %1820  ;;  %1380 = vst [vmem:[#allocation1 + $0x2] ss:$9 sm:$0xff] %v1819_v63 }
 0x35d   : > { %1382 = vst [vmem:[#allocation1 + $0x3] ss:$9 sm:$0xff] %v1821_v61 }
 0x364   : > { %v1383_v7 = vld [vmem:[#allocation1] sm:$0xff] }
 0x365   : > { %v1385_v8 = vsel %vm1347_vm11, %v1383_v7, 0.0 }
 0x366   : > { %1386 = vadd.xlane.f32.xlu0 %v1385_v8 }
 0x3d9   : > { %v1387_v11 = vpop.xlane.xlu0 %1386 }
 0x3da   : > { %1822 = vrcp.f32 %v1387_v11 }
 0x3e0   : > { %v1823_v10 = vpop.eup %1822 }
 0x3e1   : > { %v1390_v12 = vperm.slane %v1823_v10, 0  ;;  %v1392_v14 = vperm.slane %v1823_v10, 2  ;;  %v1391_v15 = vperm.slane %v1823_v10, 1  ;;  %v1393_v16 = vperm.slane %v1823_v10, 3 }
 0x3e3   : > { %v1398_v17 = vmul.f32 %v1815_v3, %v1390_v12  ;;  %v1400_v18 = vmul.f32 %v1819_v63, %v1392_v14  ;;  %v1399_v21 = vmul.f32 %v1817_v5, %v1391_v15  ;;  %v1401_v36 = vmul.f32 %v1821_v61, %v1393_v16 }
 0x3e5   : > { %1712 = vmatmul.msk.f32.vlgmr.msrb.gmra.mxu3 %vm513_vm1, %v1398_v17  ;;  %1714 = vmatmul.msk.f32.vlgmr.msra.gmra.mxu1 %vm513_vm1, %v1400_v18  ;;  %1403 = vst.msk [vmem:[%s441_s16] sm:$0x1] %vm1402_vm12, %v1398_v17 }
 0x3e6   : > { %1491 = vmatpush.msrb.mxu3 %v1824_v51  ;;  %1404 = vst.msk [vmem:[%s441_s16 + $0x1] sm:$0x1] %vm1402_vm12, %v1399_v21 }
 0x3e7   : > { %1405 = vst.msk [vmem:[%s441_s16 + $0x2] sm:$0x1] %vm1402_vm12, %v1400_v18 }
 0x3e8   : > { %1492 = vmatpush.msrb.mxu3 %v1825_v22  ;;  %1406 = vst.msk [vmem:[%s441_s16 + $0x3] sm:$0x1] %vm1402_vm12, %v1401_v36 }
 0x3ea   : > { %1493 = vmatpush.msrb.mxu3 %v1826_v20 }
 0x3ec   : > { %1494 = vmatpush.msrb.mxu3 %v1827_v23 }
 0x3ed   : > { %1713 = vmatmul.msk.f32.vlgmr.msra.gmra.mxu3 %vm513_vm1, %v1399_v21 }
 0x3f5   : > { %1715 = vmatmul.msk.f32.vlgmr.msrb.gmra.mxu3 %vm513_vm1, %v1401_v36 }
 0x3f6   : > { %1855 = shalt.err (!%p1852_p3)
}
 0x3f7   : > { %s1925_s12 = smov 16   ;;  %s1926_s18 = smov 1  }
 0x3f8   : > { %1730 = dma.vmem_to_hbm [thread:$0]  (%p2025_p5), %s1537_s17, 64, %s1539_s9, %s1509_s26, %s1925_s12, %s1925_s12, %s1926_s18  }
 0x3f9   : > { %s2429_s14 = sshll.u32 %s2332_s25, 2  ;;  %s1519_s30 = scalar_lea.hbm %s2418_s10, %s2041_s15 }
 0x3fa   : > { %s434_s23 = scalar_lea.vmem [#allocation3], %s2429_s14  ;;  %s1522_s4 = sshll.u32 %s1519_s30, 4  ;;  %s1523_s4 = int_to_ptr.hbm [resolvable:$true] %s1522_s4 }
 0x3fb   : > { %s1520_s13 = sshll.u32 %s434_s23, 4  ;;  %s1504_s17 = scalar_lea.sflag [#allocation4], %s2332_s25  ;;  %s1521_s13 = int_to_ptr.vmem [resolvable:$true] %s1520_s13 }
 0x3fc   : > { %s1870_s9 = sshra.s32 %s1523_s4, 4  ;;  %s1876_s0 = scalar_lea.hbm %s2418_s10, 8  ;;  %s1871_s9 = int_to_ptr.hbm [resolvable:$true] %s1870_s9 }
 0x3fd   : > { %s1872_s26 = scalar_lea.hbm %s1871_s9, 4  ;;  %p1877_p9 = scmp.lt.s32.totalorder %s1871_s9, %s2418_s10 }
 0x3fe   : > { %p1873_p4 = scmp.ne.s32.totalorder %s1871_s9, %s1872_s26  ;;  %p1878_p10 = scmp.lt.s32.totalorder %s1876_s0, %s1872_s26 }
 0x400   : > { %p1874_p7 = pnand %p1873_p4, %p2025_p5  ;;  %p1879_p11 = por %p1878_p10, %p1877_p9 }
 0x402   : > { %p1875_p8 = pneg %p1874_p7 }
 0x404   : > { %p1880_p12 = pnand %p1879_p11, %p1875_p8 }
 0x462   : > { %v1473_v24 = vpop.f32.mrf.mxu1 }
 0x463   : > { %1501 = vst.msk [vmem:[%s434_s23 + $0x2] sm:$0x1] %vm1402_vm12, %v1473_v24 }
 0x468   : > { %v1427_v25 = vpop.f32.mrf.mxu3 }
 0x469   : > { %1499 = vst.msk [vmem:[%s434_s23] sm:$0x1] %vm1402_vm12, %v1427_v25 }
 0x470   : > { %v1450_v26 = vpop.f32.mrf.mxu3 }
 0x471   : > { %1500 = vst.msk [vmem:[%s434_s23 + $0x1] sm:$0x1] %vm1402_vm12, %v1450_v26 }
 0x478   : > { %v1496_v27 = vpop.f32.mrf.mxu3 }
 0x479   : > { %1502 = vst.msk [vmem:[%s434_s23 + $0x3] sm:$0x1] %vm1402_vm12, %v1496_v27 }
 0x47a   : > { %1883 = shalt.err (!%p1880_p12)
}
 0x47b   : > { %1729 = dma.vmem_to_hbm [thread:$0]  (%p2025_p5), %s1521_s13, 64, %s1523_s4, %s1504_s17, %s1925_s12, %s1925_s12, %s1926_s18  }
 0x47c PF: > { %p1740_p13 = scmp.ge.s32.totalorder %s1922_s22, 2  ;;  %s1553_s25 = sand.u32 1, %s1910_s19  }
 0x47d   : > { %s1554_s23 = scalar_lea.sflag [#allocation4], %s1553_s25 }
 0x47e   : > { %p1734_p0 = pnand %p1740_p13, %p2029_p6 }
 0x480   : > { %p1735_p1 = pneg %p1734_p0 }
 0x482   : > { %1901 = dma.done.wait (%p1735_p1), %s1554_s23, 64  }
 0x483   : > { %1903 = vsyncadd (%p1735_p1), %s1554_s23, 4294967232  ;;  %s1564_s30 = scalar_lea.sflag [#allocation6], %s1553_s25 }
 0x484   : > { %1905 = dma.done.wait (%p1735_p1), %s1564_s30, 64  }
 0x485   : > { %1907 = vsyncadd (%p1735_p1), %s1564_s30, 4294967232  ;;  %p27_p5 = scmp.ge.s32.totalorder %s2013_s24, 4   ;;  %s2430_s19 = smov %s1914_s20 }
 0x486   : > { %s2431_s20 = smov %s1918_s21  ;;  %s2432_s21 = smov %s2023_s27 }
 0x487   : > { %s2433_s22 = smov %s2013_s24  ;;  %29 = sbr.rel (!%p27_p5) target bundleno = 9 (0x9), region = 137 }
 0x48c   :  { %1570 = vsyncpa [#allocation4], 1 }
 0x48d   :  { %1572 = vsyncpa [#allocation4 + $0x1], 1 }
 0x48e   :  { %1573 = vsyncpa [#allocation6], 1 }
 0x48f   :  { %1575 = vsyncpa [#allocation6 + $0x1], 1 }

</bundles_post_ra>
